<compile_context>
chip_gen: v7x
topology: tpu7x:2x2x1
jax: 0.10.0
libtpu: 0.0.40
codegen_flags: <defaults>
</compile_context>

<pallas_src>
import math
import functools

import jax
import jax.numpy as jnp
import numpy as np
from jax.experimental import pallas as pl
from jax.experimental.pallas import tpu as pltpu


# ----------------------------------------------------------------------------
# Fused kernel: embedding + PE + L x (MHA + LN + FFN + LN)
# ----------------------------------------------------------------------------
def _layer_norm(y, gamma, beta, eps=1e-5):
    mu = jnp.mean(y, axis=-1, keepdims=True)
    var = jnp.mean((y - mu) * (y - mu), axis=-1, keepdims=True)
    return (y - mu) * jax.lax.rsqrt(var + eps) * gamma + beta


def _fused_sand_kernel(x_ref, pe_ref, w_emb_ref, b_emb_ref,
                       w_qkv_ref, wo_h_ref, w_ffn_ref, vec_ref,
                       o_ref, *, n_layers, n_heads, batch, seq_len, fast):
    # x_ref:     (B*T, F)
    # pe_ref:    (B*T, D)
    # w_emb_ref: (F, D)         b_emb_ref: (1, D)
    # w_qkv_ref: (3L, D, D)     [wq, wk, wv] per layer
    # wo_h_ref:  (L*H, hd, D)   W_o split per head (rows h*hd:(h+1)*hd)
    # w_ffn_ref: (2L, D, D)     [w1, w2] per layer
    # vec_ref:   (L, 10, D)     [bq, bk, bv, bo, g1, be1, b1, b2, g2, be2]
    cdt = jnp.bfloat16 if fast else jnp.float32

    def mm(a, b):
        return jnp.dot(a.astype(cdt), b.astype(cdt),
                       preferred_element_type=jnp.float32)

    def mm_nt(a, b):  # a @ b.T via dot_general (no explicit transpose)
        return jax.lax.dot_general(
            a.astype(cdt), b.astype(cdt),
            dimension_numbers=(((1,), (1,)), ((), ())),
            preferred_element_type=jnp.float32)

    T = seq_len
    # input embedding (1x1 conv == per-timestep matmul) + positional encoding
    h = mm(x_ref[...], w_emb_ref[...]) + b_emb_ref[...] + pe_ref[...]  # (B*T, D)
    D = h.shape[-1]
    hd = D // n_heads
    scale = 1.0 / math.sqrt(hd)

    for l in range(n_layers):                      # static unroll over layers
        vl = vec_ref[l]                            # (10, D)
        q = mm(h, w_qkv_ref[3 * l + 0]) + vl[0:1]  # (B*T, D)
        k = mm(h, w_qkv_ref[3 * l + 1]) + vl[1:2]
        v = mm(h, w_qkv_ref[3 * l + 2]) + vl[2:3]

        # multi-head attention; the head concat is folded into the W_o
        # accumulation (ctx_h @ W_o[h*hd:(h+1)*hd, :] summed over heads).
        batch_outs = []
        for b in range(batch):                     # attention is per sequence
            r = slice(b * T, (b + 1) * T)
            qb, kb, vb = q[r], k[r], v[r]          # (T, D) sublane slices
            acc = None
            for hh in range(n_heads):
                c = slice(hh * hd, (hh + 1) * hd)
                s = mm_nt(qb[:, c], kb[:, c]) * scale          # (T, T)
                s = s - jnp.max(s, axis=-1, keepdims=True)
                p = jnp.exp(s)
                denom = jnp.sum(p, axis=-1, keepdims=True)
                if fast:
                    p = p * pl.reciprocal(denom, approx=True)  # EUP slot
                else:
                    p = p / denom
                ctx = mm(p, vb[:, c])                          # (T, hd)
                part = mm(ctx, wo_h_ref[l * n_heads + hh])     # (T, D)
                acc = part if acc is None else acc + part
            batch_outs.append(acc)
        attn = jnp.concatenate(batch_outs, axis=0) + vl[3:4]   # (B*T, D)

        # residual + LayerNorm 1  (dropout == identity in eval mode)
        y = _layer_norm(h + attn, vl[4:5], vl[5:6])

        # position-wise FFN: two 1x1 convs (per-timestep matmuls) with ReLU
        h1 = jnp.maximum(mm(y, w_ffn_ref[2 * l + 0]) + vl[6:7], 0.0)
        h2 = mm(h1, w_ffn_ref[2 * l + 1]) + vl[7:8]

        # residual + LayerNorm 2
        h = _layer_norm(y + h2, vl[8:9], vl[9:10])

    o_ref[...] = h


# ----------------------------------------------------------------------------
# Parameter packing and forward wrapper
# ----------------------------------------------------------------------------
def pack_layer_params(layers, n_heads):
    D = layers[0]["wq"].shape[0]
    hd = D // n_heads
    w_qkv = jnp.stack([w for lp in layers
                       for w in (lp["wq"], lp["wk"], lp["wv"])])        # (3L,D,D)
    w_ffn = jnp.stack([w for lp in layers
                       for w in (lp["w1"], lp["w2"])])                  # (2L,D,D)
    wo_h = jnp.concatenate([lp["wo"].reshape(n_heads, hd, D)
                            for lp in layers], axis=0)                  # (L*H,hd,D)
    vecs = jnp.stack([jnp.concatenate(
        [lp["bq"], lp["bk"], lp["bv"], lp["bo"],
         lp["g1"], lp["be1"], lp["b1"], lp["b2"],
         lp["g2"], lp["be2"]], axis=0) for lp in layers])               # (L,10,D)
    return w_qkv, wo_h, w_ffn, vecs


def sand_encoder_forward(x, time_stamp, params, n_heads, fast=False):
    B, T, F = x.shape
    D = params["w_emb"].shape[1]
    layers = params["layers"]
    L = len(layers)

    # NOTE: time_stamp is assumed to lie in [0, seq_len); this JAX gather
    # clamps out-of-range indices whereas PyTorch indexing would raise.
    pe = params["pe_table"][time_stamp].reshape(B * T, D)
    x2 = x.reshape(B * T, F)

    w_qkv, wo_h, w_ffn, vecs = pack_layer_params(layers, n_heads)

    kernel = functools.partial(
        _fused_sand_kernel, n_layers=L, n_heads=n_heads,
        batch=B, seq_len=T, fast=fast)

    vmem_spec = pl.BlockSpec(memory_space=pltpu.MemorySpace.VMEM)
    out = pl.pallas_call(
        kernel,
        out_shape=jax.ShapeDtypeStruct((B * T, D), jnp.float32),
        # No grid: the whole problem (~50 KB weights + a few KB activations)
        # fits VMEM on every generation (incl. v7x's 64 MiB); all operands are
        # whole-array VMEM resident for the duration of the kernel.
        in_specs=[vmem_spec] * 8,
        out_specs=vmem_spec,
    )(x2, pe, params["w_emb"], params["b_emb"], w_qkv, wo_h, w_ffn, vecs)
    return out.reshape(B, T, D)


# ----------------------------------------------------------------------------
# Parameter construction (deterministic, synthetic)
# ----------------------------------------------------------------------------
def make_pe_table(seq_len, d_model):
    pos = np.arange(seq_len, dtype=np.float32)[:, None]
    div = np.exp(np.arange(0, d_model, 2, dtype=np.float32)
                 * (-math.log(10000.0) / d_model))
    pe = np.zeros((seq_len, d_model), np.float32)
    pe[:, 0::2] = np.sin(pos * div)
    pe[:, 1::2] = np.cos(pos * div)
    return jnp.asarray(pe)


def init_params(key, input_features, seq_len, d_model, n_heads, n_layers):
    def rnd(k, shape):
        return 0.1 * jax.random.normal(k, shape, jnp.float32)

    keys = jax.random.split(key, 2 + n_layers)
    params = {
        "w_emb": rnd(keys[0], (input_features, d_model)),
        "b_emb": rnd(keys[1], (1, d_model)),
        "pe_table": make_pe_table(seq_len, d_model),
        "layers": [],
    }
    for i in range(n_layers):
        lk = jax.random.split(keys[2 + i], 14)
        lp = {
            "wq": rnd(lk[0], (d_model, d_model)), "bq": rnd(lk[1], (1, d_model)),
            "wk": rnd(lk[2], (d_model, d_model)), "bk": rnd(lk[3], (1, d_model)),
            "wv": rnd(lk[4], (d_model, d_model)), "bv": rnd(lk[5], (1, d_model)),
            "wo": rnd(lk[6], (d_model, d_model)), "bo": rnd(lk[7], (1, d_model)),
            "w1": rnd(lk[8], (d_model, d_model)), "b1": rnd(lk[9], (1, d_model)),
            "w2": rnd(lk[10], (d_model, d_model)), "b2": rnd(lk[11], (1, d_model)),
            "g1": jnp.ones((1, d_model), jnp.float32),
            "be1": jnp.zeros((1, d_model), jnp.float32),
            "g2": jnp.ones((1, d_model), jnp.float32),
            "be2": jnp.zeros((1, d_model), jnp.float32),
        }
        params["layers"].append(lp)
    return params


# ----------------------------------------------------------------------------
# Pure-JAX reference (matches PyTorch module semantics in eval mode)
# ----------------------------------------------------------------------------
def reference_forward(x, time_stamp, params, n_heads):
    pe = params["pe_table"][time_stamp]
    h = jnp.einsum("btf,fd->btd", x, params["w_emb"]) + params["b_emb"][0]
    h = h + pe
    B, T, D = h.shape
    hd = D // n_heads

    def ln(y, g, b, eps=1e-5):
        mu = jnp.mean(y, axis=-1, keepdims=True)
        var = jnp.mean((y - mu) ** 2, axis=-1, keepdims=True)
        return (y - mu) / jnp.sqrt(var + eps) * g[0] + b[0]

    for lp in params["layers"]:
        q = (h @ lp["wq"] + lp["bq"][0]).reshape(B, T, n_heads, hd)
        k = (h @ lp["wk"] + lp["bk"][0]).reshape(B, T, n_heads, hd)
        v = (h @ lp["wv"] + lp["bv"][0]).reshape(B, T, n_heads, hd)
        s = jnp.einsum("bqhd,bkhd->bhqk", q, k) / math.sqrt(hd)
        p = jax.nn.softmax(s, axis=-1)
        a = jnp.einsum("bhqk,bkhd->bqhd", p, v).reshape(B, T, D)
        a = a @ lp["wo"] + lp["bo"][0]
        y = ln(h + a, lp["g1"], lp["be1"])
        f = jnp.maximum(y @ lp["w1"] + lp["b1"][0], 0.0) @ lp["w2"] + lp["b2"][0]
        h = ln(y + f, lp["g2"], lp["be2"])
    return h


# ----------------------------------------------------------------------------
if __name__ == "__main__":
    # Module config: EncoderLayerForSAnD(input_features=4, seq_len=8,
    #                                    n_heads=4, n_layers=2, d_model=32)
    B, T, F = 2, 8, 4
    D, H, L = 32, 4, 2

    key = jax.random.PRNGKey(0)
    k_x, k_t, k_p = jax.random.split(key, 3)
    x = jax.random.normal(k_x, (B, T, F), jnp.float32)
    time_stamp = jax.random.randint(k_t, (B, T), 0, T, jnp.int32)
    params = init_params(k_p, F, T, D, H, L)

    ref = reference_forward(x, time_stamp, params, H)

    # Exact path: f32 MXU operands, exact softmax divide — tight check.
    out = jax.block_until_ready(
        sand_encoder_forward(x, time_stamp, params, H, fast=False))
    np.testing.assert_allclose(np.asarray(out), np.asarray(ref),
                               rtol=1e-4, atol=1e-4)
    assert out.shape == (B, T, D)

    # Fast path: bf16 MXU operands (f32 accumulation) + EUP approx reciprocal
    # (v6e/v7x-oriented); looser tolerance vs. the f32 reference.
    out_fast = jax.block_until_ready(
        sand_encoder_forward(x, time_stamp, params, H, fast=True))
    np.testing.assert_allclose(np.asarray(out_fast), np.asarray(ref),
                               rtol=3e-2, atol=3e-2)

    print("KERNEL_OK")
</pallas_src>

<mosaic_0001>
module attributes {stable_mosaic.version = 11 : i64} {
  func.func @_fused_sand_kernel(%arg0: memref<16x4xf32, #tpu.memory_space<vmem>>, %arg1: memref<16x32xf32, #tpu.memory_space<vmem>>, %arg2: memref<4x32xf32, #tpu.memory_space<vmem>>, %arg3: memref<1x32xf32, #tpu.memory_space<vmem>>, %arg4: memref<6x32x32xf32, #tpu.memory_space<vmem>>, %arg5: memref<8x8x32xf32, #tpu.memory_space<vmem>>, %arg6: memref<4x32x32xf32, #tpu.memory_space<vmem>>, %arg7: memref<2x10x32xf32, #tpu.memory_space<vmem>>, %arg8: memref<16x32xf32, #tpu.memory_space<vmem>>) attributes {dimension_semantics = [], scalar_prefetch = 0 : i64, scratch_operands = 0 : i64, tpu.core_type = #tpu.core_type<tc>} {
    %c0 = arith.constant 0 : index
    %c0_0 = arith.constant 0 : index
    %0 = vector.load %arg0[%c0, %c0_0] : memref<16x4xf32, #tpu.memory_space<vmem>>, vector<16x4xf32>
    %c0_1 = arith.constant 0 : index
    %c0_2 = arith.constant 0 : index
    %1 = vector.load %arg2[%c0_1, %c0_2] : memref<4x32xf32, #tpu.memory_space<vmem>>, vector<4x32xf32>
    %cst = arith.constant dense<0.000000e+00> : vector<16x32xf32>
    %2 = tpu.matmul %0, %1, %cst {dimension_numbers = #tpu.dot_dimension_numbers<[1], [0], [0], [1], [0, 0, 1, 1], [], []>} : vector<16x4xf32>, vector<4x32xf32>, vector<16x32xf32> -> vector<16x32xf32>
    %c0_3 = arith.constant 0 : index
    %c0_4 = arith.constant 0 : index
    %3 = vector.load %arg3[%c0_3, %c0_4] : memref<1x32xf32, #tpu.memory_space<vmem>>, vector<1x32xf32>
    %4 = vector.broadcast %3 : vector<1x32xf32> to vector<16x32xf32>
    %5 = arith.addf %2, %4 : vector<16x32xf32>
    %c0_5 = arith.constant 0 : index
    %c0_6 = arith.constant 0 : index
    %6 = vector.load %arg1[%c0_5, %c0_6] : memref<16x32xf32, #tpu.memory_space<vmem>>, vector<16x32xf32>
    %7 = arith.addf %5, %6 : vector<16x32xf32>
    %c0_7 = arith.constant 0 : index
    %c0_8 = arith.constant 0 : index
    %c0_9 = arith.constant 0 : index
    %8 = vector.load %arg7[%c0_7, %c0_8, %c0_9] : memref<2x10x32xf32, #tpu.memory_space<vmem>>, vector<1x10x32xf32>
    %9 = vector.shape_cast %8 : vector<1x10x32xf32> to vector<10x32xf32>
    %c0_10 = arith.constant 0 : index
    %c0_11 = arith.constant 0 : index
    %c0_12 = arith.constant 0 : index
    %10 = vector.load %arg4[%c0_10, %c0_11, %c0_12] : memref<6x32x32xf32, #tpu.memory_space<vmem>>, vector<1x32x32xf32>
    %11 = vector.shape_cast %10 : vector<1x32x32xf32> to vector<32x32xf32>
    %cst_13 = arith.constant dense<0.000000e+00> : vector<16x32xf32>
    %12 = tpu.matmul %7, %11, %cst_13 {dimension_numbers = #tpu.dot_dimension_numbers<[1], [0], [0], [1], [0, 0, 1, 1], [], []>} : vector<16x32xf32>, vector<32x32xf32>, vector<16x32xf32> -> vector<16x32xf32>
    %13 = vector.extract_strided_slice %9 {offsets = [0, 0], sizes = [1, 32], strides = [1, 1]} : vector<10x32xf32> to vector<1x32xf32>
    %14 = vector.broadcast %13 : vector<1x32xf32> to vector<16x32xf32>
    %15 = arith.addf %12, %14 : vector<16x32xf32>
    %c1 = arith.constant 1 : index
    %c0_14 = arith.constant 0 : index
    %c0_15 = arith.constant 0 : index
    %16 = vector.load %arg4[%c1, %c0_14, %c0_15] : memref<6x32x32xf32, #tpu.memory_space<vmem>>, vector<1x32x32xf32>
    %17 = vector.shape_cast %16 : vector<1x32x32xf32> to vector<32x32xf32>
    %cst_16 = arith.constant dense<0.000000e+00> : vector<16x32xf32>
    %18 = tpu.matmul %7, %17, %cst_16 {dimension_numbers = #tpu.dot_dimension_numbers<[1], [0], [0], [1], [0, 0, 1, 1], [], []>} : vector<16x32xf32>, vector<32x32xf32>, vector<16x32xf32> -> vector<16x32xf32>
    %19 = vector.extract_strided_slice %9 {offsets = [1, 0], sizes = [1, 32], strides = [1, 1]} : vector<10x32xf32> to vector<1x32xf32>
    %20 = vector.broadcast %19 : vector<1x32xf32> to vector<16x32xf32>
    %21 = arith.addf %18, %20 : vector<16x32xf32>
    %c2 = arith.constant 2 : index
    %c0_17 = arith.constant 0 : index
    %c0_18 = arith.constant 0 : index
    %22 = vector.load %arg4[%c2, %c0_17, %c0_18] : memref<6x32x32xf32, #tpu.memory_space<vmem>>, vector<1x32x32xf32>
    %23 = vector.shape_cast %22 : vector<1x32x32xf32> to vector<32x32xf32>
    %cst_19 = arith.constant dense<0.000000e+00> : vector<16x32xf32>
    %24 = tpu.matmul %7, %23, %cst_19 {dimension_numbers = #tpu.dot_dimension_numbers<[1], [0], [0], [1], [0, 0, 1, 1], [], []>} : vector<16x32xf32>, vector<32x32xf32>, vector<16x32xf32> -> vector<16x32xf32>
    %25 = vector.extract_strided_slice %9 {offsets = [2, 0], sizes = [1, 32], strides = [1, 1]} : vector<10x32xf32> to vector<1x32xf32>
    %26 = vector.broadcast %25 : vector<1x32xf32> to vector<16x32xf32>
    %27 = arith.addf %24, %26 : vector<16x32xf32>
    %28 = vector.extract_strided_slice %15 {offsets = [0, 0], sizes = [8, 32], strides = [1, 1]} : vector<16x32xf32> to vector<8x32xf32>
    %29 = vector.extract_strided_slice %21 {offsets = [0, 0], sizes = [8, 32], strides = [1, 1]} : vector<16x32xf32> to vector<8x32xf32>
    %30 = vector.extract_strided_slice %27 {offsets = [0, 0], sizes = [8, 32], strides = [1, 1]} : vector<16x32xf32> to vector<8x32xf32>
    %31 = vector.extract_strided_slice %28 {offsets = [0, 0], sizes = [8, 8], strides = [1, 1]} : vector<8x32xf32> to vector<8x8xf32>
    %32 = vector.extract_strided_slice %29 {offsets = [0, 0], sizes = [8, 8], strides = [1, 1]} : vector<8x32xf32> to vector<8x8xf32>
    %cst_20 = arith.constant dense<0.000000e+00> : vector<8x8xf32>
    %33 = tpu.matmul %31, %32, %cst_20 {dimension_numbers = #tpu.dot_dimension_numbers<[1], [1], [0], [0], [0, 0, 1, 0], [], []>} : vector<8x8xf32>, vector<8x8xf32>, vector<8x8xf32> -> vector<8x8xf32>
    %cst_21 = arith.constant 0.353553385 : f32
    %34 = vector.broadcast %cst_21 : f32 to vector<8x8xf32>
    %35 = arith.mulf %33, %34 : vector<8x8xf32>
    %cst_22 = arith.constant dense<0xFF800000> : vector<8xf32>
    %36 = vector.multi_reduction <maximumf>, %35, %cst_22 [1] : vector<8x8xf32> to vector<8xf32>
    %37 = vector.shape_cast %36 : vector<8xf32> to vector<8x1xf32>
    %38 = vector.broadcast %37 : vector<8x1xf32> to vector<8x8xf32>
    %39 = arith.subf %35, %38 : vector<8x8xf32>
    %40 = math.exp %39 : vector<8x8xf32>
    %cst_23 = arith.constant dense<0.000000e+00> : vector<8xf32>
    %41 = vector.multi_reduction <add>, %40, %cst_23 [1] : vector<8x8xf32> to vector<8xf32>
    %42 = vector.shape_cast %41 : vector<8xf32> to vector<8x1xf32>
    %43 = vector.broadcast %42 : vector<8x1xf32> to vector<8x8xf32>
    %44 = arith.divf %40, %43 : vector<8x8xf32>
    %45 = vector.extract_strided_slice %30 {offsets = [0, 0], sizes = [8, 8], strides = [1, 1]} : vector<8x32xf32> to vector<8x8xf32>
    %cst_24 = arith.constant dense<0.000000e+00> : vector<8x8xf32>
    %46 = tpu.matmul %44, %45, %cst_24 {dimension_numbers = #tpu.dot_dimension_numbers<[1], [0], [0], [1], [0, 0, 1, 1], [], []>} : vector<8x8xf32>, vector<8x8xf32>, vector<8x8xf32> -> vector<8x8xf32>
    %c0_25 = arith.constant 0 : index
    %c0_26 = arith.constant 0 : index
    %c0_27 = arith.constant 0 : index
    %47 = vector.load %arg5[%c0_25, %c0_26, %c0_27] : memref<8x8x32xf32, #tpu.memory_space<vmem>>, vector<1x8x32xf32>
    %48 = vector.shape_cast %47 : vector<1x8x32xf32> to vector<8x32xf32>
    %cst_28 = arith.constant dense<0.000000e+00> : vector<8x32xf32>
    %49 = tpu.matmul %46, %48, %cst_28 {dimension_numbers = #tpu.dot_dimension_numbers<[1], [0], [0], [1], [0, 0, 1, 1], [], []>} : vector<8x8xf32>, vector<8x32xf32>, vector<8x32xf32> -> vector<8x32xf32>
    %50 = vector.extract_strided_slice %28 {offsets = [0, 8], sizes = [8, 8], strides = [1, 1]} : vector<8x32xf32> to vector<8x8xf32>
    %51 = vector.extract_strided_slice %29 {offsets = [0, 8], sizes = [8, 8], strides = [1, 1]} : vector<8x32xf32> to vector<8x8xf32>
    %cst_29 = arith.constant dense<0.000000e+00> : vector<8x8xf32>
    %52 = tpu.matmul %50, %51, %cst_29 {dimension_numbers = #tpu.dot_dimension_numbers<[1], [1], [0], [0], [0, 0, 1, 0], [], []>} : vector<8x8xf32>, vector<8x8xf32>, vector<8x8xf32> -> vector<8x8xf32>
    %cst_30 = arith.constant 0.353553385 : f32
    %53 = vector.broadcast %cst_30 : f32 to vector<8x8xf32>
    %54 = arith.mulf %52, %53 : vector<8x8xf32>
    %cst_31 = arith.constant dense<0xFF800000> : vector<8xf32>
    %55 = vector.multi_reduction <maximumf>, %54, %cst_31 [1] : vector<8x8xf32> to vector<8xf32>
    %56 = vector.shape_cast %55 : vector<8xf32> to vector<8x1xf32>
    %57 = vector.broadcast %56 : vector<8x1xf32> to vector<8x8xf32>
    %58 = arith.subf %54, %57 : vector<8x8xf32>
    %59 = math.exp %58 : vector<8x8xf32>
    %cst_32 = arith.constant dense<0.000000e+00> : vector<8xf32>
    %60 = vector.multi_reduction <add>, %59, %cst_32 [1] : vector<8x8xf32> to vector<8xf32>
    %61 = vector.shape_cast %60 : vector<8xf32> to vector<8x1xf32>
    %62 = vector.broadcast %61 : vector<8x1xf32> to vector<8x8xf32>
    %63 = arith.divf %59, %62 : vector<8x8xf32>
    %64 = vector.extract_strided_slice %30 {offsets = [0, 8], sizes = [8, 8], strides = [1, 1]} : vector<8x32xf32> to vector<8x8xf32>
    %cst_33 = arith.constant dense<0.000000e+00> : vector<8x8xf32>
    %65 = tpu.matmul %63, %64, %cst_33 {dimension_numbers = #tpu.dot_dimension_numbers<[1], [0], [0], [1], [0, 0, 1, 1], [], []>} : vector<8x8xf32>, vector<8x8xf32>, vector<8x8xf32> -> vector<8x8xf32>
    %c1_34 = arith.constant 1 : index
    %c0_35 = arith.constant 0 : index
    %c0_36 = arith.constant 0 : index
    %66 = vector.load %arg5[%c1_34, %c0_35, %c0_36] : memref<8x8x32xf32, #tpu.memory_space<vmem>>, vector<1x8x32xf32>
    %67 = vector.shape_cast %66 : vector<1x8x32xf32> to vector<8x32xf32>
    %cst_37 = arith.constant dense<0.000000e+00> : vector<8x32xf32>
    %68 = tpu.matmul %65, %67, %cst_37 {dimension_numbers = #tpu.dot_dimension_numbers<[1], [0], [0], [1], [0, 0, 1, 1], [], []>} : vector<8x8xf32>, vector<8x32xf32>, vector<8x32xf32> -> vector<8x32xf32>
    %69 = arith.addf %49, %68 : vector<8x32xf32>
    %70 = vector.extract_strided_slice %28 {offsets = [0, 16], sizes = [8, 8], strides = [1, 1]} : vector<8x32xf32> to vector<8x8xf32>
    %71 = vector.extract_strided_slice %29 {offsets = [0, 16], sizes = [8, 8], strides = [1, 1]} : vector<8x32xf32> to vector<8x8xf32>
    %cst_38 = arith.constant dense<0.000000e+00> : vector<8x8xf32>
    %72 = tpu.matmul %70, %71, %cst_38 {dimension_numbers = #tpu.dot_dimension_numbers<[1], [1], [0], [0], [0, 0, 1, 0], [], []>} : vector<8x8xf32>, vector<8x8xf32>, vector<8x8xf32> -> vector<8x8xf32>
    %cst_39 = arith.constant 0.353553385 : f32
    %73 = vector.broadcast %cst_39 : f32 to vector<8x8xf32>
    %74 = arith.mulf %72, %73 : vector<8x8xf32>
    %cst_40 = arith.constant dense<0xFF800000> : vector<8xf32>
    %75 = vector.multi_reduction <maximumf>, %74, %cst_40 [1] : vector<8x8xf32> to vector<8xf32>
    %76 = vector.shape_cast %75 : vector<8xf32> to vector<8x1xf32>
    %77 = vector.broadcast %76 : vector<8x1xf32> to vector<8x8xf32>
    %78 = arith.subf %74, %77 : vector<8x8xf32>
    %79 = math.exp %78 : vector<8x8xf32>
    %cst_41 = arith.constant dense<0.000000e+00> : vector<8xf32>
    %80 = vector.multi_reduction <add>, %79, %cst_41 [1] : vector<8x8xf32> to vector<8xf32>
    %81 = vector.shape_cast %80 : vector<8xf32> to vector<8x1xf32>
    %82 = vector.broadcast %81 : vector<8x1xf32> to vector<8x8xf32>
    %83 = arith.divf %79, %82 : vector<8x8xf32>
    %84 = vector.extract_strided_slice %30 {offsets = [0, 16], sizes = [8, 8], strides = [1, 1]} : vector<8x32xf32> to vector<8x8xf32>
    %cst_42 = arith.constant dense<0.000000e+00> : vector<8x8xf32>
    %85 = tpu.matmul %83, %84, %cst_42 {dimension_numbers = #tpu.dot_dimension_numbers<[1], [0], [0], [1], [0, 0, 1, 1], [], []>} : vector<8x8xf32>, vector<8x8xf32>, vector<8x8xf32> -> vector<8x8xf32>
    %c2_43 = arith.constant 2 : index
    %c0_44 = arith.constant 0 : index
    %c0_45 = arith.constant 0 : index
    %86 = vector.load %arg5[%c2_43, %c0_44, %c0_45] : memref<8x8x32xf32, #tpu.memory_space<vmem>>, vector<1x8x32xf32>
    %87 = vector.shape_cast %86 : vector<1x8x32xf32> to vector<8x32xf32>
    %cst_46 = arith.constant dense<0.000000e+00> : vector<8x32xf32>
    %88 = tpu.matmul %85, %87, %cst_46 {dimension_numbers = #tpu.dot_dimension_numbers<[1], [0], [0], [1], [0, 0, 1, 1], [], []>} : vector<8x8xf32>, vector<8x32xf32>, vector<8x32xf32> -> vector<8x32xf32>
    %89 = arith.addf %69, %88 : vector<8x32xf32>
    %90 = vector.extract_strided_slice %28 {offsets = [0, 24], sizes = [8, 8], strides = [1, 1]} : vector<8x32xf32> to vector<8x8xf32>
    %91 = vector.extract_strided_slice %29 {offsets = [0, 24], sizes = [8, 8], strides = [1, 1]} : vector<8x32xf32> to vector<8x8xf32>
    %cst_47 = arith.constant dense<0.000000e+00> : vector<8x8xf32>
    %92 = tpu.matmul %90, %91, %cst_47 {dimension_numbers = #tpu.dot_dimension_numbers<[1], [1], [0], [0], [0, 0, 1, 0], [], []>} : vector<8x8xf32>, vector<8x8xf32>, vector<8x8xf32> -> vector<8x8xf32>
    %cst_48 = arith.constant 0.353553385 : f32
    %93 = vector.broadcast %cst_48 : f32 to vector<8x8xf32>
    %94 = arith.mulf %92, %93 : vector<8x8xf32>
    %cst_49 = arith.constant dense<0xFF800000> : vector<8xf32>
    %95 = vector.multi_reduction <maximumf>, %94, %cst_49 [1] : vector<8x8xf32> to vector<8xf32>
    %96 = vector.shape_cast %95 : vector<8xf32> to vector<8x1xf32>
    %97 = vector.broadcast %96 : vector<8x1xf32> to vector<8x8xf32>
    %98 = arith.subf %94, %97 : vector<8x8xf32>
    %99 = math.exp %98 : vector<8x8xf32>
    %cst_50 = arith.constant dense<0.000000e+00> : vector<8xf32>
    %100 = vector.multi_reduction <add>, %99, %cst_50 [1] : vector<8x8xf32> to vector<8xf32>
    %101 = vector.shape_cast %100 : vector<8xf32> to vector<8x1xf32>
    %102 = vector.broadcast %101 : vector<8x1xf32> to vector<8x8xf32>
    %103 = arith.divf %99, %102 : vector<8x8xf32>
    %104 = vector.extract_strided_slice %30 {offsets = [0, 24], sizes = [8, 8], strides = [1, 1]} : vector<8x32xf32> to vector<8x8xf32>
    %cst_51 = arith.constant dense<0.000000e+00> : vector<8x8xf32>
    %105 = tpu.matmul %103, %104, %cst_51 {dimension_numbers = #tpu.dot_dimension_numbers<[1], [0], [0], [1], [0, 0, 1, 1], [], []>} : vector<8x8xf32>, vector<8x8xf32>, vector<8x8xf32> -> vector<8x8xf32>
    %c3 = arith.constant 3 : index
    %c0_52 = arith.constant 0 : index
    %c0_53 = arith.constant 0 : index
    %106 = vector.load %arg5[%c3, %c0_52, %c0_53] : memref<8x8x32xf32, #tpu.memory_space<vmem>>, vector<1x8x32xf32>
    %107 = vector.shape_cast %106 : vector<1x8x32xf32> to vector<8x32xf32>
    %cst_54 = arith.constant dense<0.000000e+00> : vector<8x32xf32>
    %108 = tpu.matmul %105, %107, %cst_54 {dimension_numbers = #tpu.dot_dimension_numbers<[1], [0], [0], [1], [0, 0, 1, 1], [], []>} : vector<8x8xf32>, vector<8x32xf32>, vector<8x32xf32> -> vector<8x32xf32>
    %109 = arith.addf %89, %108 : vector<8x32xf32>
    %110 = vector.extract_strided_slice %15 {offsets = [8, 0], sizes = [8, 32], strides = [1, 1]} : vector<16x32xf32> to vector<8x32xf32>
    %111 = vector.extract_strided_slice %21 {offsets = [8, 0], sizes = [8, 32], strides = [1, 1]} : vector<16x32xf32> to vector<8x32xf32>
    %112 = vector.extract_strided_slice %27 {offsets = [8, 0], sizes = [8, 32], strides = [1, 1]} : vector<16x32xf32> to vector<8x32xf32>
    %113 = vector.extract_strided_slice %110 {offsets = [0, 0], sizes = [8, 8], strides = [1, 1]} : vector<8x32xf32> to vector<8x8xf32>
    %114 = vector.extract_strided_slice %111 {offsets = [0, 0], sizes = [8, 8], strides = [1, 1]} : vector<8x32xf32> to vector<8x8xf32>
    %cst_55 = arith.constant dense<0.000000e+00> : vector<8x8xf32>
    %115 = tpu.matmul %113, %114, %cst_55 {dimension_numbers = #tpu.dot_dimension_numbers<[1], [1], [0], [0], [0, 0, 1, 0], [], []>} : vector<8x8xf32>, vector<8x8xf32>, vector<8x8xf32> -> vector<8x8xf32>
    %cst_56 = arith.constant 0.353553385 : f32
    %116 = vector.broadcast %cst_56 : f32 to vector<8x8xf32>
    %117 = arith.mulf %115, %116 : vector<8x8xf32>
    %cst_57 = arith.constant dense<0xFF800000> : vector<8xf32>
    %118 = vector.multi_reduction <maximumf>, %117, %cst_57 [1] : vector<8x8xf32> to vector<8xf32>
    %119 = vector.shape_cast %118 : vector<8xf32> to vector<8x1xf32>
    %120 = vector.broadcast %119 : vector<8x1xf32> to vector<8x8xf32>
    %121 = arith.subf %117, %120 : vector<8x8xf32>
    %122 = math.exp %121 : vector<8x8xf32>
    %cst_58 = arith.constant dense<0.000000e+00> : vector<8xf32>
    %123 = vector.multi_reduction <add>, %122, %cst_58 [1] : vector<8x8xf32> to vector<8xf32>
    %124 = vector.shape_cast %123 : vector<8xf32> to vector<8x1xf32>
    %125 = vector.broadcast %124 : vector<8x1xf32> to vector<8x8xf32>
    %126 = arith.divf %122, %125 : vector<8x8xf32>
    %127 = vector.extract_strided_slice %112 {offsets = [0, 0], sizes = [8, 8], strides = [1, 1]} : vector<8x32xf32> to vector<8x8xf32>
    %cst_59 = arith.constant dense<0.000000e+00> : vector<8x8xf32>
    %128 = tpu.matmul %126, %127, %cst_59 {dimension_numbers = #tpu.dot_dimension_numbers<[1], [0], [0], [1], [0, 0, 1, 1], [], []>} : vector<8x8xf32>, vector<8x8xf32>, vector<8x8xf32> -> vector<8x8xf32>
    %c0_60 = arith.constant 0 : index
    %c0_61 = arith.constant 0 : index
    %c0_62 = arith.constant 0 : index
    %129 = vector.load %arg5[%c0_60, %c0_61, %c0_62] : memref<8x8x32xf32, #tpu.memory_space<vmem>>, vector<1x8x32xf32>
    %130 = vector.shape_cast %129 : vector<1x8x32xf32> to vector<8x32xf32>
    %cst_63 = arith.constant dense<0.000000e+00> : vector<8x32xf32>
    %131 = tpu.matmul %128, %130, %cst_63 {dimension_numbers = #tpu.dot_dimension_numbers<[1], [0], [0], [1], [0, 0, 1, 1], [], []>} : vector<8x8xf32>, vector<8x32xf32>, vector<8x32xf32> -> vector<8x32xf32>
    %132 = vector.extract_strided_slice %110 {offsets = [0, 8], sizes = [8, 8], strides = [1, 1]} : vector<8x32xf32> to vector<8x8xf32>
    %133 = vector.extract_strided_slice %111 {offsets = [0, 8], sizes = [8, 8], strides = [1, 1]} : vector<8x32xf32> to vector<8x8xf32>
    %cst_64 = arith.constant dense<0.000000e+00> : vector<8x8xf32>
    %134 = tpu.matmul %132, %133, %cst_64 {dimension_numbers = #tpu.dot_dimension_numbers<[1], [1], [0], [0], [0, 0, 1, 0], [], []>} : vector<8x8xf32>, vector<8x8xf32>, vector<8x8xf32> -> vector<8x8xf32>
    %cst_65 = arith.constant 0.353553385 : f32
    %135 = vector.broadcast %cst_65 : f32 to vector<8x8xf32>
    %136 = arith.mulf %134, %135 : vector<8x8xf32>
    %cst_66 = arith.constant dense<0xFF800000> : vector<8xf32>
    %137 = vector.multi_reduction <maximumf>, %136, %cst_66 [1] : vector<8x8xf32> to vector<8xf32>
    %138 = vector.shape_cast %137 : vector<8xf32> to vector<8x1xf32>
    %139 = vector.broadcast %138 : vector<8x1xf32> to vector<8x8xf32>
    %140 = arith.subf %136, %139 : vector<8x8xf32>
    %141 = math.exp %140 : vector<8x8xf32>
    %cst_67 = arith.constant dense<0.000000e+00> : vector<8xf32>
    %142 = vector.multi_reduction <add>, %141, %cst_67 [1] : vector<8x8xf32> to vector<8xf32>
    %143 = vector.shape_cast %142 : vector<8xf32> to vector<8x1xf32>
    %144 = vector.broadcast %143 : vector<8x1xf32> to vector<8x8xf32>
    %145 = arith.divf %141, %144 : vector<8x8xf32>
    %146 = vector.extract_strided_slice %112 {offsets = [0, 8], sizes = [8, 8], strides = [1, 1]} : vector<8x32xf32> to vector<8x8xf32>
    %cst_68 = arith.constant dense<0.000000e+00> : vector<8x8xf32>
    %147 = tpu.matmul %145, %146, %cst_68 {dimension_numbers = #tpu.dot_dimension_numbers<[1], [0], [0], [1], [0, 0, 1, 1], [], []>} : vector<8x8xf32>, vector<8x8xf32>, vector<8x8xf32> -> vector<8x8xf32>
    %c1_69 = arith.constant 1 : index
    %c0_70 = arith.constant 0 : index
    %c0_71 = arith.constant 0 : index
    %148 = vector.load %arg5[%c1_69, %c0_70, %c0_71] : memref<8x8x32xf32, #tpu.memory_space<vmem>>, vector<1x8x32xf32>
    %149 = vector.shape_cast %148 : vector<1x8x32xf32> to vector<8x32xf32>
    %cst_72 = arith.constant dense<0.000000e+00> : vector<8x32xf32>
    %150 = tpu.matmul %147, %149, %cst_72 {dimension_numbers = #tpu.dot_dimension_numbers<[1], [0], [0], [1], [0, 0, 1, 1], [], []>} : vector<8x8xf32>, vector<8x32xf32>, vector<8x32xf32> -> vector<8x32xf32>
    %151 = arith.addf %131, %150 : vector<8x32xf32>
    %152 = vector.extract_strided_slice %110 {offsets = [0, 16], sizes = [8, 8], strides = [1, 1]} : vector<8x32xf32> to vector<8x8xf32>
    %153 = vector.extract_strided_slice %111 {offsets = [0, 16], sizes = [8, 8], strides = [1, 1]} : vector<8x32xf32> to vector<8x8xf32>
    %cst_73 = arith.constant dense<0.000000e+00> : vector<8x8xf32>
    %154 = tpu.matmul %152, %153, %cst_73 {dimension_numbers = #tpu.dot_dimension_numbers<[1], [1], [0], [0], [0, 0, 1, 0], [], []>} : vector<8x8xf32>, vector<8x8xf32>, vector<8x8xf32> -> vector<8x8xf32>
    %cst_74 = arith.constant 0.353553385 : f32
    %155 = vector.broadcast %cst_74 : f32 to vector<8x8xf32>
    %156 = arith.mulf %154, %155 : vector<8x8xf32>
    %cst_75 = arith.constant dense<0xFF800000> : vector<8xf32>
    %157 = vector.multi_reduction <maximumf>, %156, %cst_75 [1] : vector<8x8xf32> to vector<8xf32>
    %158 = vector.shape_cast %157 : vector<8xf32> to vector<8x1xf32>
    %159 = vector.broadcast %158 : vector<8x1xf32> to vector<8x8xf32>
    %160 = arith.subf %156, %159 : vector<8x8xf32>
    %161 = math.exp %160 : vector<8x8xf32>
    %cst_76 = arith.constant dense<0.000000e+00> : vector<8xf32>
    %162 = vector.multi_reduction <add>, %161, %cst_76 [1] : vector<8x8xf32> to vector<8xf32>
    %163 = vector.shape_cast %162 : vector<8xf32> to vector<8x1xf32>
    %164 = vector.broadcast %163 : vector<8x1xf32> to vector<8x8xf32>
    %165 = arith.divf %161, %164 : vector<8x8xf32>
    %166 = vector.extract_strided_slice %112 {offsets = [0, 16], sizes = [8, 8], strides = [1, 1]} : vector<8x32xf32> to vector<8x8xf32>
    %cst_77 = arith.constant dense<0.000000e+00> : vector<8x8xf32>
    %167 = tpu.matmul %165, %166, %cst_77 {dimension_numbers = #tpu.dot_dimension_numbers<[1], [0], [0], [1], [0, 0, 1, 1], [], []>} : vector<8x8xf32>, vector<8x8xf32>, vector<8x8xf32> -> vector<8x8xf32>
    %c2_78 = arith.constant 2 : index
    %c0_79 = arith.constant 0 : index
    %c0_80 = arith.constant 0 : index
    %168 = vector.load %arg5[%c2_78, %c0_79, %c0_80] : memref<8x8x32xf32, #tpu.memory_space<vmem>>, vector<1x8x32xf32>
    %169 = vector.shape_cast %168 : vector<1x8x32xf32> to vector<8x32xf32>
    %cst_81 = arith.constant dense<0.000000e+00> : vector<8x32xf32>
    %170 = tpu.matmul %167, %169, %cst_81 {dimension_numbers = #tpu.dot_dimension_numbers<[1], [0], [0], [1], [0, 0, 1, 1], [], []>} : vector<8x8xf32>, vector<8x32xf32>, vector<8x32xf32> -> vector<8x32xf32>
    %171 = arith.addf %151, %170 : vector<8x32xf32>
    %172 = vector.extract_strided_slice %110 {offsets = [0, 24], sizes = [8, 8], strides = [1, 1]} : vector<8x32xf32> to vector<8x8xf32>
    %173 = vector.extract_strided_slice %111 {offsets = [0, 24], sizes = [8, 8], strides = [1, 1]} : vector<8x32xf32> to vector<8x8xf32>
    %cst_82 = arith.constant dense<0.000000e+00> : vector<8x8xf32>
    %174 = tpu.matmul %172, %173, %cst_82 {dimension_numbers = #tpu.dot_dimension_numbers<[1], [1], [0], [0], [0, 0, 1, 0], [], []>} : vector<8x8xf32>, vector<8x8xf32>, vector<8x8xf32> -> vector<8x8xf32>
    %cst_83 = arith.constant 0.353553385 : f32
    %175 = vector.broadcast %cst_83 : f32 to vector<8x8xf32>
    %176 = arith.mulf %174, %175 : vector<8x8xf32>
    %cst_84 = arith.constant dense<0xFF800000> : vector<8xf32>
    %177 = vector.multi_reduction <maximumf>, %176, %cst_84 [1] : vector<8x8xf32> to vector<8xf32>
    %178 = vector.shape_cast %177 : vector<8xf32> to vector<8x1xf32>
    %179 = vector.broadcast %178 : vector<8x1xf32> to vector<8x8xf32>
    %180 = arith.subf %176, %179 : vector<8x8xf32>
    %181 = math.exp %180 : vector<8x8xf32>
    %cst_85 = arith.constant dense<0.000000e+00> : vector<8xf32>
    %182 = vector.multi_reduction <add>, %181, %cst_85 [1] : vector<8x8xf32> to vector<8xf32>
    %183 = vector.shape_cast %182 : vector<8xf32> to vector<8x1xf32>
    %184 = vector.broadcast %183 : vector<8x1xf32> to vector<8x8xf32>
    %185 = arith.divf %181, %184 : vector<8x8xf32>
    %186 = vector.extract_strided_slice %112 {offsets = [0, 24], sizes = [8, 8], strides = [1, 1]} : vector<8x32xf32> to vector<8x8xf32>
    %cst_86 = arith.constant dense<0.000000e+00> : vector<8x8xf32>
    %187 = tpu.matmul %185, %186, %cst_86 {dimension_numbers = #tpu.dot_dimension_numbers<[1], [0], [0], [1], [0, 0, 1, 1], [], []>} : vector<8x8xf32>, vector<8x8xf32>, vector<8x8xf32> -> vector<8x8xf32>
    %c3_87 = arith.constant 3 : index
    %c0_88 = arith.constant 0 : index
    %c0_89 = arith.constant 0 : index
    %188 = vector.load %arg5[%c3_87, %c0_88, %c0_89] : memref<8x8x32xf32, #tpu.memory_space<vmem>>, vector<1x8x32xf32>
    %189 = vector.shape_cast %188 : vector<1x8x32xf32> to vector<8x32xf32>
    %cst_90 = arith.constant dense<0.000000e+00> : vector<8x32xf32>
    %190 = tpu.matmul %187, %189, %cst_90 {dimension_numbers = #tpu.dot_dimension_numbers<[1], [0], [0], [1], [0, 0, 1, 1], [], []>} : vector<8x8xf32>, vector<8x32xf32>, vector<8x32xf32> -> vector<8x32xf32>
    %191 = arith.addf %171, %190 : vector<8x32xf32>
    %192 = tpu.concatenate %109, %191 in 0 : vector<8x32xf32>, vector<8x32xf32> -> vector<16x32xf32>
    %193 = vector.extract_strided_slice %9 {offsets = [3, 0], sizes = [1, 32], strides = [1, 1]} : vector<10x32xf32> to vector<1x32xf32>
    %194 = vector.broadcast %193 : vector<1x32xf32> to vector<16x32xf32>
    %195 = arith.addf %192, %194 : vector<16x32xf32>
    %196 = arith.addf %7, %195 : vector<16x32xf32>
    %197 = vector.extract_strided_slice %9 {offsets = [4, 0], sizes = [1, 32], strides = [1, 1]} : vector<10x32xf32> to vector<1x32xf32>
    %198 = vector.extract_strided_slice %9 {offsets = [5, 0], sizes = [1, 32], strides = [1, 1]} : vector<10x32xf32> to vector<1x32xf32>
    %cst_91 = arith.constant dense<0.000000e+00> : vector<16xf32>
    %199 = vector.multi_reduction <add>, %196, %cst_91 [1] : vector<16x32xf32> to vector<16xf32>
    %200 = vector.shape_cast %199 : vector<16xf32> to vector<16x1xf32>
    %cst_92 = arith.constant 3.200000e+01 : f32
    %201 = vector.broadcast %cst_92 : f32 to vector<16x1xf32>
    %202 = arith.divf %200, %201 : vector<16x1xf32>
    %203 = vector.broadcast %202 : vector<16x1xf32> to vector<16x32xf32>
    %204 = arith.subf %196, %203 : vector<16x32xf32>
    %205 = vector.broadcast %202 : vector<16x1xf32> to vector<16x32xf32>
    %206 = arith.subf %196, %205 : vector<16x32xf32>
    %207 = arith.mulf %204, %206 : vector<16x32xf32>
    %cst_93 = arith.constant dense<0.000000e+00> : vector<16xf32>
    %208 = vector.multi_reduction <add>, %207, %cst_93 [1] : vector<16x32xf32> to vector<16xf32>
    %209 = vector.shape_cast %208 : vector<16xf32> to vector<16x1xf32>
    %cst_94 = arith.constant 3.200000e+01 : f32
    %210 = vector.broadcast %cst_94 : f32 to vector<16x1xf32>
    %211 = arith.divf %209, %210 : vector<16x1xf32>
    %212 = vector.broadcast %202 : vector<16x1xf32> to vector<16x32xf32>
    %213 = arith.subf %196, %212 : vector<16x32xf32>
    %cst_95 = arith.constant 9.99999974E-6 : f32
    %214 = vector.broadcast %cst_95 : f32 to vector<16x1xf32>
    %215 = arith.addf %211, %214 : vector<16x1xf32>
    %216 = math.rsqrt %215 : vector<16x1xf32>
    %217 = vector.broadcast %216 : vector<16x1xf32> to vector<16x32xf32>
    %218 = arith.mulf %213, %217 : vector<16x32xf32>
    %219 = vector.broadcast %197 : vector<1x32xf32> to vector<16x32xf32>
    %220 = arith.mulf %218, %219 : vector<16x32xf32>
    %221 = vector.broadcast %198 : vector<1x32xf32> to vector<16x32xf32>
    %222 = arith.addf %220, %221 : vector<16x32xf32>
    %c0_96 = arith.constant 0 : index
    %c0_97 = arith.constant 0 : index
    %c0_98 = arith.constant 0 : index
    %223 = vector.load %arg6[%c0_96, %c0_97, %c0_98] : memref<4x32x32xf32, #tpu.memory_space<vmem>>, vector<1x32x32xf32>
    %224 = vector.shape_cast %223 : vector<1x32x32xf32> to vector<32x32xf32>
    %cst_99 = arith.constant dense<0.000000e+00> : vector<16x32xf32>
    %225 = tpu.matmul %222, %224, %cst_99 {dimension_numbers = #tpu.dot_dimension_numbers<[1], [0], [0], [1], [0, 0, 1, 1], [], []>} : vector<16x32xf32>, vector<32x32xf32>, vector<16x32xf32> -> vector<16x32xf32>
    %226 = vector.extract_strided_slice %9 {offsets = [6, 0], sizes = [1, 32], strides = [1, 1]} : vector<10x32xf32> to vector<1x32xf32>
    %227 = vector.broadcast %226 : vector<1x32xf32> to vector<16x32xf32>
    %228 = arith.addf %225, %227 : vector<16x32xf32>
    %cst_100 = arith.constant 0.000000e+00 : f32
    %229 = vector.broadcast %cst_100 : f32 to vector<16x32xf32>
    %230 = arith.maximumf %228, %229 : vector<16x32xf32>
    %c1_101 = arith.constant 1 : index
    %c0_102 = arith.constant 0 : index
    %c0_103 = arith.constant 0 : index
    %231 = vector.load %arg6[%c1_101, %c0_102, %c0_103] : memref<4x32x32xf32, #tpu.memory_space<vmem>>, vector<1x32x32xf32>
    %232 = vector.shape_cast %231 : vector<1x32x32xf32> to vector<32x32xf32>
    %cst_104 = arith.constant dense<0.000000e+00> : vector<16x32xf32>
    %233 = tpu.matmul %230, %232, %cst_104 {dimension_numbers = #tpu.dot_dimension_numbers<[1], [0], [0], [1], [0, 0, 1, 1], [], []>} : vector<16x32xf32>, vector<32x32xf32>, vector<16x32xf32> -> vector<16x32xf32>
    %234 = vector.extract_strided_slice %9 {offsets = [7, 0], sizes = [1, 32], strides = [1, 1]} : vector<10x32xf32> to vector<1x32xf32>
    %235 = vector.broadcast %234 : vector<1x32xf32> to vector<16x32xf32>
    %236 = arith.addf %233, %235 : vector<16x32xf32>
    %237 = arith.addf %222, %236 : vector<16x32xf32>
    %238 = vector.extract_strided_slice %9 {offsets = [8, 0], sizes = [1, 32], strides = [1, 1]} : vector<10x32xf32> to vector<1x32xf32>
    %239 = vector.extract_strided_slice %9 {offsets = [9, 0], sizes = [1, 32], strides = [1, 1]} : vector<10x32xf32> to vector<1x32xf32>
    %cst_105 = arith.constant dense<0.000000e+00> : vector<16xf32>
    %240 = vector.multi_reduction <add>, %237, %cst_105 [1] : vector<16x32xf32> to vector<16xf32>
    %241 = vector.shape_cast %240 : vector<16xf32> to vector<16x1xf32>
    %cst_106 = arith.constant 3.200000e+01 : f32
    %242 = vector.broadcast %cst_106 : f32 to vector<16x1xf32>
    %243 = arith.divf %241, %242 : vector<16x1xf32>
    %244 = vector.broadcast %243 : vector<16x1xf32> to vector<16x32xf32>
    %245 = arith.subf %237, %244 : vector<16x32xf32>
    %246 = vector.broadcast %243 : vector<16x1xf32> to vector<16x32xf32>
    %247 = arith.subf %237, %246 : vector<16x32xf32>
    %248 = arith.mulf %245, %247 : vector<16x32xf32>
    %cst_107 = arith.constant dense<0.000000e+00> : vector<16xf32>
    %249 = vector.multi_reduction <add>, %248, %cst_107 [1] : vector<16x32xf32> to vector<16xf32>
    %250 = vector.shape_cast %249 : vector<16xf32> to vector<16x1xf32>
    %cst_108 = arith.constant 3.200000e+01 : f32
    %251 = vector.broadcast %cst_108 : f32 to vector<16x1xf32>
    %252 = arith.divf %250, %251 : vector<16x1xf32>
    %253 = vector.broadcast %243 : vector<16x1xf32> to vector<16x32xf32>
    %254 = arith.subf %237, %253 : vector<16x32xf32>
    %cst_109 = arith.constant 9.99999974E-6 : f32
    %255 = vector.broadcast %cst_109 : f32 to vector<16x1xf32>
    %256 = arith.addf %252, %255 : vector<16x1xf32>
    %257 = math.rsqrt %256 : vector<16x1xf32>
    %258 = vector.broadcast %257 : vector<16x1xf32> to vector<16x32xf32>
    %259 = arith.mulf %254, %258 : vector<16x32xf32>
    %260 = vector.broadcast %238 : vector<1x32xf32> to vector<16x32xf32>
    %261 = arith.mulf %259, %260 : vector<16x32xf32>
    %262 = vector.broadcast %239 : vector<1x32xf32> to vector<16x32xf32>
    %263 = arith.addf %261, %262 : vector<16x32xf32>
    %c1_110 = arith.constant 1 : index
    %c0_111 = arith.constant 0 : index
    %c0_112 = arith.constant 0 : index
    %264 = vector.load %arg7[%c1_110, %c0_111, %c0_112] : memref<2x10x32xf32, #tpu.memory_space<vmem>>, vector<1x10x32xf32>
    %265 = vector.shape_cast %264 : vector<1x10x32xf32> to vector<10x32xf32>
    %c3_113 = arith.constant 3 : index
    %c0_114 = arith.constant 0 : index
    %c0_115 = arith.constant 0 : index
    %266 = vector.load %arg4[%c3_113, %c0_114, %c0_115] : memref<6x32x32xf32, #tpu.memory_space<vmem>>, vector<1x32x32xf32>
    %267 = vector.shape_cast %266 : vector<1x32x32xf32> to vector<32x32xf32>
    %cst_116 = arith.constant dense<0.000000e+00> : vector<16x32xf32>
    %268 = tpu.matmul %263, %267, %cst_116 {dimension_numbers = #tpu.dot_dimension_numbers<[1], [0], [0], [1], [0, 0, 1, 1], [], []>} : vector<16x32xf32>, vector<32x32xf32>, vector<16x32xf32> -> vector<16x32xf32>
    %269 = vector.extract_strided_slice %265 {offsets = [0, 0], sizes = [1, 32], strides = [1, 1]} : vector<10x32xf32> to vector<1x32xf32>
    %270 = vector.broadcast %269 : vector<1x32xf32> to vector<16x32xf32>
    %271 = arith.addf %268, %270 : vector<16x32xf32>
    %c4 = arith.constant 4 : index
    %c0_117 = arith.constant 0 : index
    %c0_118 = arith.constant 0 : index
    %272 = vector.load %arg4[%c4, %c0_117, %c0_118] : memref<6x32x32xf32, #tpu.memory_space<vmem>>, vector<1x32x32xf32>
    %273 = vector.shape_cast %272 : vector<1x32x32xf32> to vector<32x32xf32>
    %cst_119 = arith.constant dense<0.000000e+00> : vector<16x32xf32>
    %274 = tpu.matmul %263, %273, %cst_119 {dimension_numbers = #tpu.dot_dimension_numbers<[1], [0], [0], [1], [0, 0, 1, 1], [], []>} : vector<16x32xf32>, vector<32x32xf32>, vector<16x32xf32> -> vector<16x32xf32>
    %275 = vector.extract_strided_slice %265 {offsets = [1, 0], sizes = [1, 32], strides = [1, 1]} : vector<10x32xf32> to vector<1x32xf32>
    %276 = vector.broadcast %275 : vector<1x32xf32> to vector<16x32xf32>
    %277 = arith.addf %274, %276 : vector<16x32xf32>
    %c5 = arith.constant 5 : index
    %c0_120 = arith.constant 0 : index
    %c0_121 = arith.constant 0 : index
    %278 = vector.load %arg4[%c5, %c0_120, %c0_121] : memref<6x32x32xf32, #tpu.memory_space<vmem>>, vector<1x32x32xf32>
    %279 = vector.shape_cast %278 : vector<1x32x32xf32> to vector<32x32xf32>
    %cst_122 = arith.constant dense<0.000000e+00> : vector<16x32xf32>
    %280 = tpu.matmul %263, %279, %cst_122 {dimension_numbers = #tpu.dot_dimension_numbers<[1], [0], [0], [1], [0, 0, 1, 1], [], []>} : vector<16x32xf32>, vector<32x32xf32>, vector<16x32xf32> -> vector<16x32xf32>
    %281 = vector.extract_strided_slice %265 {offsets = [2, 0], sizes = [1, 32], strides = [1, 1]} : vector<10x32xf32> to vector<1x32xf32>
    %282 = vector.broadcast %281 : vector<1x32xf32> to vector<16x32xf32>
    %283 = arith.addf %280, %282 : vector<16x32xf32>
    %284 = vector.extract_strided_slice %271 {offsets = [0, 0], sizes = [8, 32], strides = [1, 1]} : vector<16x32xf32> to vector<8x32xf32>
    %285 = vector.extract_strided_slice %277 {offsets = [0, 0], sizes = [8, 32], strides = [1, 1]} : vector<16x32xf32> to vector<8x32xf32>
    %286 = vector.extract_strided_slice %283 {offsets = [0, 0], sizes = [8, 32], strides = [1, 1]} : vector<16x32xf32> to vector<8x32xf32>
    %287 = vector.extract_strided_slice %284 {offsets = [0, 0], sizes = [8, 8], strides = [1, 1]} : vector<8x32xf32> to vector<8x8xf32>
    %288 = vector.extract_strided_slice %285 {offsets = [0, 0], sizes = [8, 8], strides = [1, 1]} : vector<8x32xf32> to vector<8x8xf32>
    %cst_123 = arith.constant dense<0.000000e+00> : vector<8x8xf32>
    %289 = tpu.matmul %287, %288, %cst_123 {dimension_numbers = #tpu.dot_dimension_numbers<[1], [1], [0], [0], [0, 0, 1, 0], [], []>} : vector<8x8xf32>, vector<8x8xf32>, vector<8x8xf32> -> vector<8x8xf32>
    %cst_124 = arith.constant 0.353553385 : f32
    %290 = vector.broadcast %cst_124 : f32 to vector<8x8xf32>
    %291 = arith.mulf %289, %290 : vector<8x8xf32>
    %cst_125 = arith.constant dense<0xFF800000> : vector<8xf32>
    %292 = vector.multi_reduction <maximumf>, %291, %cst_125 [1] : vector<8x8xf32> to vector<8xf32>
    %293 = vector.shape_cast %292 : vector<8xf32> to vector<8x1xf32>
    %294 = vector.broadcast %293 : vector<8x1xf32> to vector<8x8xf32>
    %295 = arith.subf %291, %294 : vector<8x8xf32>
    %296 = math.exp %295 : vector<8x8xf32>
    %cst_126 = arith.constant dense<0.000000e+00> : vector<8xf32>
    %297 = vector.multi_reduction <add>, %296, %cst_126 [1] : vector<8x8xf32> to vector<8xf32>
    %298 = vector.shape_cast %297 : vector<8xf32> to vector<8x1xf32>
    %299 = vector.broadcast %298 : vector<8x1xf32> to vector<8x8xf32>
    %300 = arith.divf %296, %299 : vector<8x8xf32>
    %301 = vector.extract_strided_slice %286 {offsets = [0, 0], sizes = [8, 8], strides = [1, 1]} : vector<8x32xf32> to vector<8x8xf32>
    %cst_127 = arith.constant dense<0.000000e+00> : vector<8x8xf32>
    %302 = tpu.matmul %300, %301, %cst_127 {dimension_numbers = #tpu.dot_dimension_numbers<[1], [0], [0], [1], [0, 0, 1, 1], [], []>} : vector<8x8xf32>, vector<8x8xf32>, vector<8x8xf32> -> vector<8x8xf32>
    %c4_128 = arith.constant 4 : index
    %c0_129 = arith.constant 0 : index
    %c0_130 = arith.constant 0 : index
    %303 = vector.load %arg5[%c4_128, %c0_129, %c0_130] : memref<8x8x32xf32, #tpu.memory_space<vmem>>, vector<1x8x32xf32>
    %304 = vector.shape_cast %303 : vector<1x8x32xf32> to vector<8x32xf32>
    %cst_131 = arith.constant dense<0.000000e+00> : vector<8x32xf32>
    %305 = tpu.matmul %302, %304, %cst_131 {dimension_numbers = #tpu.dot_dimension_numbers<[1], [0], [0], [1], [0, 0, 1, 1], [], []>} : vector<8x8xf32>, vector<8x32xf32>, vector<8x32xf32> -> vector<8x32xf32>
    %306 = vector.extract_strided_slice %284 {offsets = [0, 8], sizes = [8, 8], strides = [1, 1]} : vector<8x32xf32> to vector<8x8xf32>
    %307 = vector.extract_strided_slice %285 {offsets = [0, 8], sizes = [8, 8], strides = [1, 1]} : vector<8x32xf32> to vector<8x8xf32>
    %cst_132 = arith.constant dense<0.000000e+00> : vector<8x8xf32>
    %308 = tpu.matmul %306, %307, %cst_132 {dimension_numbers = #tpu.dot_dimension_numbers<[1], [1], [0], [0], [0, 0, 1, 0], [], []>} : vector<8x8xf32>, vector<8x8xf32>, vector<8x8xf32> -> vector<8x8xf32>
    %cst_133 = arith.constant 0.353553385 : f32
    %309 = vector.broadcast %cst_133 : f32 to vector<8x8xf32>
    %310 = arith.mulf %308, %309 : vector<8x8xf32>
    %cst_134 = arith.constant dense<0xFF800000> : vector<8xf32>
    %311 = vector.multi_reduction <maximumf>, %310, %cst_134 [1] : vector<8x8xf32> to vector<8xf32>
    %312 = vector.shape_cast %311 : vector<8xf32> to vector<8x1xf32>
    %313 = vector.broadcast %312 : vector<8x1xf32> to vector<8x8xf32>
    %314 = arith.subf %310, %313 : vector<8x8xf32>
    %315 = math.exp %314 : vector<8x8xf32>
    %cst_135 = arith.constant dense<0.000000e+00> : vector<8xf32>
    %316 = vector.multi_reduction <add>, %315, %cst_135 [1] : vector<8x8xf32> to vector<8xf32>
    %317 = vector.shape_cast %316 : vector<8xf32> to vector<8x1xf32>
    %318 = vector.broadcast %317 : vector<8x1xf32> to vector<8x8xf32>
    %319 = arith.divf %315, %318 : vector<8x8xf32>
    %320 = vector.extract_strided_slice %286 {offsets = [0, 8], sizes = [8, 8], strides = [1, 1]} : vector<8x32xf32> to vector<8x8xf32>
    %cst_136 = arith.constant dense<0.000000e+00> : vector<8x8xf32>
    %321 = tpu.matmul %319, %320, %cst_136 {dimension_numbers = #tpu.dot_dimension_numbers<[1], [0], [0], [1], [0, 0, 1, 1], [], []>} : vector<8x8xf32>, vector<8x8xf32>, vector<8x8xf32> -> vector<8x8xf32>
    %c5_137 = arith.constant 5 : index
    %c0_138 = arith.constant 0 : index
    %c0_139 = arith.constant 0 : index
    %322 = vector.load %arg5[%c5_137, %c0_138, %c0_139] : memref<8x8x32xf32, #tpu.memory_space<vmem>>, vector<1x8x32xf32>
    %323 = vector.shape_cast %322 : vector<1x8x32xf32> to vector<8x32xf32>
    %cst_140 = arith.constant dense<0.000000e+00> : vector<8x32xf32>
    %324 = tpu.matmul %321, %323, %cst_140 {dimension_numbers = #tpu.dot_dimension_numbers<[1], [0], [0], [1], [0, 0, 1, 1], [], []>} : vector<8x8xf32>, vector<8x32xf32>, vector<8x32xf32> -> vector<8x32xf32>
    %325 = arith.addf %305, %324 : vector<8x32xf32>
    %326 = vector.extract_strided_slice %284 {offsets = [0, 16], sizes = [8, 8], strides = [1, 1]} : vector<8x32xf32> to vector<8x8xf32>
    %327 = vector.extract_strided_slice %285 {offsets = [0, 16], sizes = [8, 8], strides = [1, 1]} : vector<8x32xf32> to vector<8x8xf32>
    %cst_141 = arith.constant dense<0.000000e+00> : vector<8x8xf32>
    %328 = tpu.matmul %326, %327, %cst_141 {dimension_numbers = #tpu.dot_dimension_numbers<[1], [1], [0], [0], [0, 0, 1, 0], [], []>} : vector<8x8xf32>, vector<8x8xf32>, vector<8x8xf32> -> vector<8x8xf32>
    %cst_142 = arith.constant 0.353553385 : f32
    %329 = vector.broadcast %cst_142 : f32 to vector<8x8xf32>
    %330 = arith.mulf %328, %329 : vector<8x8xf32>
    %cst_143 = arith.constant dense<0xFF800000> : vector<8xf32>
    %331 = vector.multi_reduction <maximumf>, %330, %cst_143 [1] : vector<8x8xf32> to vector<8xf32>
    %332 = vector.shape_cast %331 : vector<8xf32> to vector<8x1xf32>
    %333 = vector.broadcast %332 : vector<8x1xf32> to vector<8x8xf32>
    %334 = arith.subf %330, %333 : vector<8x8xf32>
    %335 = math.exp %334 : vector<8x8xf32>
    %cst_144 = arith.constant dense<0.000000e+00> : vector<8xf32>
    %336 = vector.multi_reduction <add>, %335, %cst_144 [1] : vector<8x8xf32> to vector<8xf32>
    %337 = vector.shape_cast %336 : vector<8xf32> to vector<8x1xf32>
    %338 = vector.broadcast %337 : vector<8x1xf32> to vector<8x8xf32>
    %339 = arith.divf %335, %338 : vector<8x8xf32>
    %340 = vector.extract_strided_slice %286 {offsets = [0, 16], sizes = [8, 8], strides = [1, 1]} : vector<8x32xf32> to vector<8x8xf32>
    %cst_145 = arith.constant dense<0.000000e+00> : vector<8x8xf32>
    %341 = tpu.matmul %339, %340, %cst_145 {dimension_numbers = #tpu.dot_dimension_numbers<[1], [0], [0], [1], [0, 0, 1, 1], [], []>} : vector<8x8xf32>, vector<8x8xf32>, vector<8x8xf32> -> vector<8x8xf32>
    %c6 = arith.constant 6 : index
    %c0_146 = arith.constant 0 : index
    %c0_147 = arith.constant 0 : index
    %342 = vector.load %arg5[%c6, %c0_146, %c0_147] : memref<8x8x32xf32, #tpu.memory_space<vmem>>, vector<1x8x32xf32>
    %343 = vector.shape_cast %342 : vector<1x8x32xf32> to vector<8x32xf32>
    %cst_148 = arith.constant dense<0.000000e+00> : vector<8x32xf32>
    %344 = tpu.matmul %341, %343, %cst_148 {dimension_numbers = #tpu.dot_dimension_numbers<[1], [0], [0], [1], [0, 0, 1, 1], [], []>} : vector<8x8xf32>, vector<8x32xf32>, vector<8x32xf32> -> vector<8x32xf32>
    %345 = arith.addf %325, %344 : vector<8x32xf32>
    %346 = vector.extract_strided_slice %284 {offsets = [0, 24], sizes = [8, 8], strides = [1, 1]} : vector<8x32xf32> to vector<8x8xf32>
    %347 = vector.extract_strided_slice %285 {offsets = [0, 24], sizes = [8, 8], strides = [1, 1]} : vector<8x32xf32> to vector<8x8xf32>
    %cst_149 = arith.constant dense<0.000000e+00> : vector<8x8xf32>
    %348 = tpu.matmul %346, %347, %cst_149 {dimension_numbers = #tpu.dot_dimension_numbers<[1], [1], [0], [0], [0, 0, 1, 0], [], []>} : vector<8x8xf32>, vector<8x8xf32>, vector<8x8xf32> -> vector<8x8xf32>
    %cst_150 = arith.constant 0.353553385 : f32
    %349 = vector.broadcast %cst_150 : f32 to vector<8x8xf32>
    %350 = arith.mulf %348, %349 : vector<8x8xf32>
    %cst_151 = arith.constant dense<0xFF800000> : vector<8xf32>
    %351 = vector.multi_reduction <maximumf>, %350, %cst_151 [1] : vector<8x8xf32> to vector<8xf32>
    %352 = vector.shape_cast %351 : vector<8xf32> to vector<8x1xf32>
    %353 = vector.broadcast %352 : vector<8x1xf32> to vector<8x8xf32>
    %354 = arith.subf %350, %353 : vector<8x8xf32>
    %355 = math.exp %354 : vector<8x8xf32>
    %cst_152 = arith.constant dense<0.000000e+00> : vector<8xf32>
    %356 = vector.multi_reduction <add>, %355, %cst_152 [1] : vector<8x8xf32> to vector<8xf32>
    %357 = vector.shape_cast %356 : vector<8xf32> to vector<8x1xf32>
    %358 = vector.broadcast %357 : vector<8x1xf32> to vector<8x8xf32>
    %359 = arith.divf %355, %358 : vector<8x8xf32>
    %360 = vector.extract_strided_slice %286 {offsets = [0, 24], sizes = [8, 8], strides = [1, 1]} : vector<8x32xf32> to vector<8x8xf32>
    %cst_153 = arith.constant dense<0.000000e+00> : vector<8x8xf32>
    %361 = tpu.matmul %359, %360, %cst_153 {dimension_numbers = #tpu.dot_dimension_numbers<[1], [0], [0], [1], [0, 0, 1, 1], [], []>} : vector<8x8xf32>, vector<8x8xf32>, vector<8x8xf32> -> vector<8x8xf32>
    %c7 = arith.constant 7 : index
    %c0_154 = arith.constant 0 : index
    %c0_155 = arith.constant 0 : index
    %362 = vector.load %arg5[%c7, %c0_154, %c0_155] : memref<8x8x32xf32, #tpu.memory_space<vmem>>, vector<1x8x32xf32>
    %363 = vector.shape_cast %362 : vector<1x8x32xf32> to vector<8x32xf32>
    %cst_156 = arith.constant dense<0.000000e+00> : vector<8x32xf32>
    %364 = tpu.matmul %361, %363, %cst_156 {dimension_numbers = #tpu.dot_dimension_numbers<[1], [0], [0], [1], [0, 0, 1, 1], [], []>} : vector<8x8xf32>, vector<8x32xf32>, vector<8x32xf32> -> vector<8x32xf32>
    %365 = arith.addf %345, %364 : vector<8x32xf32>
    %366 = vector.extract_strided_slice %271 {offsets = [8, 0], sizes = [8, 32], strides = [1, 1]} : vector<16x32xf32> to vector<8x32xf32>
    %367 = vector.extract_strided_slice %277 {offsets = [8, 0], sizes = [8, 32], strides = [1, 1]} : vector<16x32xf32> to vector<8x32xf32>
    %368 = vector.extract_strided_slice %283 {offsets = [8, 0], sizes = [8, 32], strides = [1, 1]} : vector<16x32xf32> to vector<8x32xf32>
    %369 = vector.extract_strided_slice %366 {offsets = [0, 0], sizes = [8, 8], strides = [1, 1]} : vector<8x32xf32> to vector<8x8xf32>
    %370 = vector.extract_strided_slice %367 {offsets = [0, 0], sizes = [8, 8], strides = [1, 1]} : vector<8x32xf32> to vector<8x8xf32>
    %cst_157 = arith.constant dense<0.000000e+00> : vector<8x8xf32>
    %371 = tpu.matmul %369, %370, %cst_157 {dimension_numbers = #tpu.dot_dimension_numbers<[1], [1], [0], [0], [0, 0, 1, 0], [], []>} : vector<8x8xf32>, vector<8x8xf32>, vector<8x8xf32> -> vector<8x8xf32>
    %cst_158 = arith.constant 0.353553385 : f32
    %372 = vector.broadcast %cst_158 : f32 to vector<8x8xf32>
    %373 = arith.mulf %371, %372 : vector<8x8xf32>
    %cst_159 = arith.constant dense<0xFF800000> : vector<8xf32>
    %374 = vector.multi_reduction <maximumf>, %373, %cst_159 [1] : vector<8x8xf32> to vector<8xf32>
    %375 = vector.shape_cast %374 : vector<8xf32> to vector<8x1xf32>
    %376 = vector.broadcast %375 : vector<8x1xf32> to vector<8x8xf32>
    %377 = arith.subf %373, %376 : vector<8x8xf32>
    %378 = math.exp %377 : vector<8x8xf32>
    %cst_160 = arith.constant dense<0.000000e+00> : vector<8xf32>
    %379 = vector.multi_reduction <add>, %378, %cst_160 [1] : vector<8x8xf32> to vector<8xf32>
    %380 = vector.shape_cast %379 : vector<8xf32> to vector<8x1xf32>
    %381 = vector.broadcast %380 : vector<8x1xf32> to vector<8x8xf32>
    %382 = arith.divf %378, %381 : vector<8x8xf32>
    %383 = vector.extract_strided_slice %368 {offsets = [0, 0], sizes = [8, 8], strides = [1, 1]} : vector<8x32xf32> to vector<8x8xf32>
    %cst_161 = arith.constant dense<0.000000e+00> : vector<8x8xf32>
    %384 = tpu.matmul %382, %383, %cst_161 {dimension_numbers = #tpu.dot_dimension_numbers<[1], [0], [0], [1], [0, 0, 1, 1], [], []>} : vector<8x8xf32>, vector<8x8xf32>, vector<8x8xf32> -> vector<8x8xf32>
    %c4_162 = arith.constant 4 : index
    %c0_163 = arith.constant 0 : index
    %c0_164 = arith.constant 0 : index
    %385 = vector.load %arg5[%c4_162, %c0_163, %c0_164] : memref<8x8x32xf32, #tpu.memory_space<vmem>>, vector<1x8x32xf32>
    %386 = vector.shape_cast %385 : vector<1x8x32xf32> to vector<8x32xf32>
    %cst_165 = arith.constant dense<0.000000e+00> : vector<8x32xf32>
    %387 = tpu.matmul %384, %386, %cst_165 {dimension_numbers = #tpu.dot_dimension_numbers<[1], [0], [0], [1], [0, 0, 1, 1], [], []>} : vector<8x8xf32>, vector<8x32xf32>, vector<8x32xf32> -> vector<8x32xf32>
    %388 = vector.extract_strided_slice %366 {offsets = [0, 8], sizes = [8, 8], strides = [1, 1]} : vector<8x32xf32> to vector<8x8xf32>
    %389 = vector.extract_strided_slice %367 {offsets = [0, 8], sizes = [8, 8], strides = [1, 1]} : vector<8x32xf32> to vector<8x8xf32>
    %cst_166 = arith.constant dense<0.000000e+00> : vector<8x8xf32>
    %390 = tpu.matmul %388, %389, %cst_166 {dimension_numbers = #tpu.dot_dimension_numbers<[1], [1], [0], [0], [0, 0, 1, 0], [], []>} : vector<8x8xf32>, vector<8x8xf32>, vector<8x8xf32> -> vector<8x8xf32>
    %cst_167 = arith.constant 0.353553385 : f32
    %391 = vector.broadcast %cst_167 : f32 to vector<8x8xf32>
    %392 = arith.mulf %390, %391 : vector<8x8xf32>
    %cst_168 = arith.constant dense<0xFF800000> : vector<8xf32>
    %393 = vector.multi_reduction <maximumf>, %392, %cst_168 [1] : vector<8x8xf32> to vector<8xf32>
    %394 = vector.shape_cast %393 : vector<8xf32> to vector<8x1xf32>
    %395 = vector.broadcast %394 : vector<8x1xf32> to vector<8x8xf32>
    %396 = arith.subf %392, %395 : vector<8x8xf32>
    %397 = math.exp %396 : vector<8x8xf32>
    %cst_169 = arith.constant dense<0.000000e+00> : vector<8xf32>
    %398 = vector.multi_reduction <add>, %397, %cst_169 [1] : vector<8x8xf32> to vector<8xf32>
    %399 = vector.shape_cast %398 : vector<8xf32> to vector<8x1xf32>
    %400 = vector.broadcast %399 : vector<8x1xf32> to vector<8x8xf32>
    %401 = arith.divf %397, %400 : vector<8x8xf32>
    %402 = vector.extract_strided_slice %368 {offsets = [0, 8], sizes = [8, 8], strides = [1, 1]} : vector<8x32xf32> to vector<8x8xf32>
    %cst_170 = arith.constant dense<0.000000e+00> : vector<8x8xf32>
    %403 = tpu.matmul %401, %402, %cst_170 {dimension_numbers = #tpu.dot_dimension_numbers<[1], [0], [0], [1], [0, 0, 1, 1], [], []>} : vector<8x8xf32>, vector<8x8xf32>, vector<8x8xf32> -> vector<8x8xf32>
    %c5_171 = arith.constant 5 : index
    %c0_172 = arith.constant 0 : index
    %c0_173 = arith.constant 0 : index
    %404 = vector.load %arg5[%c5_171, %c0_172, %c0_173] : memref<8x8x32xf32, #tpu.memory_space<vmem>>, vector<1x8x32xf32>
    %405 = vector.shape_cast %404 : vector<1x8x32xf32> to vector<8x32xf32>
    %cst_174 = arith.constant dense<0.000000e+00> : vector<8x32xf32>
    %406 = tpu.matmul %403, %405, %cst_174 {dimension_numbers = #tpu.dot_dimension_numbers<[1], [0], [0], [1], [0, 0, 1, 1], [], []>} : vector<8x8xf32>, vector<8x32xf32>, vector<8x32xf32> -> vector<8x32xf32>
    %407 = arith.addf %387, %406 : vector<8x32xf32>
    %408 = vector.extract_strided_slice %366 {offsets = [0, 16], sizes = [8, 8], strides = [1, 1]} : vector<8x32xf32> to vector<8x8xf32>
    %409 = vector.extract_strided_slice %367 {offsets = [0, 16], sizes = [8, 8], strides = [1, 1]} : vector<8x32xf32> to vector<8x8xf32>
    %cst_175 = arith.constant dense<0.000000e+00> : vector<8x8xf32>
    %410 = tpu.matmul %408, %409, %cst_175 {dimension_numbers = #tpu.dot_dimension_numbers<[1], [1], [0], [0], [0, 0, 1, 0], [], []>} : vector<8x8xf32>, vector<8x8xf32>, vector<8x8xf32> -> vector<8x8xf32>
    %cst_176 = arith.constant 0.353553385 : f32
    %411 = vector.broadcast %cst_176 : f32 to vector<8x8xf32>
    %412 = arith.mulf %410, %411 : vector<8x8xf32>
    %cst_177 = arith.constant dense<0xFF800000> : vector<8xf32>
    %413 = vector.multi_reduction <maximumf>, %412, %cst_177 [1] : vector<8x8xf32> to vector<8xf32>
    %414 = vector.shape_cast %413 : vector<8xf32> to vector<8x1xf32>
    %415 = vector.broadcast %414 : vector<8x1xf32> to vector<8x8xf32>
    %416 = arith.subf %412, %415 : vector<8x8xf32>
    %417 = math.exp %416 : vector<8x8xf32>
    %cst_178 = arith.constant dense<0.000000e+00> : vector<8xf32>
    %418 = vector.multi_reduction <add>, %417, %cst_178 [1] : vector<8x8xf32> to vector<8xf32>
    %419 = vector.shape_cast %418 : vector<8xf32> to vector<8x1xf32>
    %420 = vector.broadcast %419 : vector<8x1xf32> to vector<8x8xf32>
    %421 = arith.divf %417, %420 : vector<8x8xf32>
    %422 = vector.extract_strided_slice %368 {offsets = [0, 16], sizes = [8, 8], strides = [1, 1]} : vector<8x32xf32> to vector<8x8xf32>
    %cst_179 = arith.constant dense<0.000000e+00> : vector<8x8xf32>
    %423 = tpu.matmul %421, %422, %cst_179 {dimension_numbers = #tpu.dot_dimension_numbers<[1], [0], [0], [1], [0, 0, 1, 1], [], []>} : vector<8x8xf32>, vector<8x8xf32>, vector<8x8xf32> -> vector<8x8xf32>
    %c6_180 = arith.constant 6 : index
    %c0_181 = arith.constant 0 : index
    %c0_182 = arith.constant 0 : index
    %424 = vector.load %arg5[%c6_180, %c0_181, %c0_182] : memref<8x8x32xf32, #tpu.memory_space<vmem>>, vector<1x8x32xf32>
    %425 = vector.shape_cast %424 : vector<1x8x32xf32> to vector<8x32xf32>
    %cst_183 = arith.constant dense<0.000000e+00> : vector<8x32xf32>
    %426 = tpu.matmul %423, %425, %cst_183 {dimension_numbers = #tpu.dot_dimension_numbers<[1], [0], [0], [1], [0, 0, 1, 1], [], []>} : vector<8x8xf32>, vector<8x32xf32>, vector<8x32xf32> -> vector<8x32xf32>
    %427 = arith.addf %407, %426 : vector<8x32xf32>
    %428 = vector.extract_strided_slice %366 {offsets = [0, 24], sizes = [8, 8], strides = [1, 1]} : vector<8x32xf32> to vector<8x8xf32>
    %429 = vector.extract_strided_slice %367 {offsets = [0, 24], sizes = [8, 8], strides = [1, 1]} : vector<8x32xf32> to vector<8x8xf32>
    %cst_184 = arith.constant dense<0.000000e+00> : vector<8x8xf32>
    %430 = tpu.matmul %428, %429, %cst_184 {dimension_numbers = #tpu.dot_dimension_numbers<[1], [1], [0], [0], [0, 0, 1, 0], [], []>} : vector<8x8xf32>, vector<8x8xf32>, vector<8x8xf32> -> vector<8x8xf32>
    %cst_185 = arith.constant 0.353553385 : f32
    %431 = vector.broadcast %cst_185 : f32 to vector<8x8xf32>
    %432 = arith.mulf %430, %431 : vector<8x8xf32>
    %cst_186 = arith.constant dense<0xFF800000> : vector<8xf32>
    %433 = vector.multi_reduction <maximumf>, %432, %cst_186 [1] : vector<8x8xf32> to vector<8xf32>
    %434 = vector.shape_cast %433 : vector<8xf32> to vector<8x1xf32>
    %435 = vector.broadcast %434 : vector<8x1xf32> to vector<8x8xf32>
    %436 = arith.subf %432, %435 : vector<8x8xf32>
    %437 = math.exp %436 : vector<8x8xf32>
    %cst_187 = arith.constant dense<0.000000e+00> : vector<8xf32>
    %438 = vector.multi_reduction <add>, %437, %cst_187 [1] : vector<8x8xf32> to vector<8xf32>
    %439 = vector.shape_cast %438 : vector<8xf32> to vector<8x1xf32>
    %440 = vector.broadcast %439 : vector<8x1xf32> to vector<8x8xf32>
    %441 = arith.divf %437, %440 : vector<8x8xf32>
    %442 = vector.extract_strided_slice %368 {offsets = [0, 24], sizes = [8, 8], strides = [1, 1]} : vector<8x32xf32> to vector<8x8xf32>
    %cst_188 = arith.constant dense<0.000000e+00> : vector<8x8xf32>
    %443 = tpu.matmul %441, %442, %cst_188 {dimension_numbers = #tpu.dot_dimension_numbers<[1], [0], [0], [1], [0, 0, 1, 1], [], []>} : vector<8x8xf32>, vector<8x8xf32>, vector<8x8xf32> -> vector<8x8xf32>
    %c7_189 = arith.constant 7 : index
    %c0_190 = arith.constant 0 : index
    %c0_191 = arith.constant 0 : index
    %444 = vector.load %arg5[%c7_189, %c0_190, %c0_191] : memref<8x8x32xf32, #tpu.memory_space<vmem>>, vector<1x8x32xf32>
    %445 = vector.shape_cast %444 : vector<1x8x32xf32> to vector<8x32xf32>
    %cst_192 = arith.constant dense<0.000000e+00> : vector<8x32xf32>
    %446 = tpu.matmul %443, %445, %cst_192 {dimension_numbers = #tpu.dot_dimension_numbers<[1], [0], [0], [1], [0, 0, 1, 1], [], []>} : vector<8x8xf32>, vector<8x32xf32>, vector<8x32xf32> -> vector<8x32xf32>
    %447 = arith.addf %427, %446 : vector<8x32xf32>
    %448 = tpu.concatenate %365, %447 in 0 : vector<8x32xf32>, vector<8x32xf32> -> vector<16x32xf32>
    %449 = vector.extract_strided_slice %265 {offsets = [3, 0], sizes = [1, 32], strides = [1, 1]} : vector<10x32xf32> to vector<1x32xf32>
    %450 = vector.broadcast %449 : vector<1x32xf32> to vector<16x32xf32>
    %451 = arith.addf %448, %450 : vector<16x32xf32>
    %452 = arith.addf %263, %451 : vector<16x32xf32>
    %453 = vector.extract_strided_slice %265 {offsets = [4, 0], sizes = [1, 32], strides = [1, 1]} : vector<10x32xf32> to vector<1x32xf32>
    %454 = vector.extract_strided_slice %265 {offsets = [5, 0], sizes = [1, 32], strides = [1, 1]} : vector<10x32xf32> to vector<1x32xf32>
    %cst_193 = arith.constant dense<0.000000e+00> : vector<16xf32>
    %455 = vector.multi_reduction <add>, %452, %cst_193 [1] : vector<16x32xf32> to vector<16xf32>
    %456 = vector.shape_cast %455 : vector<16xf32> to vector<16x1xf32>
    %cst_194 = arith.constant 3.200000e+01 : f32
    %457 = vector.broadcast %cst_194 : f32 to vector<16x1xf32>
    %458 = arith.divf %456, %457 : vector<16x1xf32>
    %459 = vector.broadcast %458 : vector<16x1xf32> to vector<16x32xf32>
    %460 = arith.subf %452, %459 : vector<16x32xf32>
    %461 = vector.broadcast %458 : vector<16x1xf32> to vector<16x32xf32>
    %462 = arith.subf %452, %461 : vector<16x32xf32>
    %463 = arith.mulf %460, %462 : vector<16x32xf32>
    %cst_195 = arith.constant dense<0.000000e+00> : vector<16xf32>
    %464 = vector.multi_reduction <add>, %463, %cst_195 [1] : vector<16x32xf32> to vector<16xf32>
    %465 = vector.shape_cast %464 : vector<16xf32> to vector<16x1xf32>
    %cst_196 = arith.constant 3.200000e+01 : f32
    %466 = vector.broadcast %cst_196 : f32 to vector<16x1xf32>
    %467 = arith.divf %465, %466 : vector<16x1xf32>
    %468 = vector.broadcast %458 : vector<16x1xf32> to vector<16x32xf32>
    %469 = arith.subf %452, %468 : vector<16x32xf32>
    %cst_197 = arith.constant 9.99999974E-6 : f32
    %470 = vector.broadcast %cst_197 : f32 to vector<16x1xf32>
    %471 = arith.addf %467, %470 : vector<16x1xf32>
    %472 = math.rsqrt %471 : vector<16x1xf32>
    %473 = vector.broadcast %472 : vector<16x1xf32> to vector<16x32xf32>
    %474 = arith.mulf %469, %473 : vector<16x32xf32>
    %475 = vector.broadcast %453 : vector<1x32xf32> to vector<16x32xf32>
    %476 = arith.mulf %474, %475 : vector<16x32xf32>
    %477 = vector.broadcast %454 : vector<1x32xf32> to vector<16x32xf32>
    %478 = arith.addf %476, %477 : vector<16x32xf32>
    %c2_198 = arith.constant 2 : index
    %c0_199 = arith.constant 0 : index
    %c0_200 = arith.constant 0 : index
    %479 = vector.load %arg6[%c2_198, %c0_199, %c0_200] : memref<4x32x32xf32, #tpu.memory_space<vmem>>, vector<1x32x32xf32>
    %480 = vector.shape_cast %479 : vector<1x32x32xf32> to vector<32x32xf32>
    %cst_201 = arith.constant dense<0.000000e+00> : vector<16x32xf32>
    %481 = tpu.matmul %478, %480, %cst_201 {dimension_numbers = #tpu.dot_dimension_numbers<[1], [0], [0], [1], [0, 0, 1, 1], [], []>} : vector<16x32xf32>, vector<32x32xf32>, vector<16x32xf32> -> vector<16x32xf32>
    %482 = vector.extract_strided_slice %265 {offsets = [6, 0], sizes = [1, 32], strides = [1, 1]} : vector<10x32xf32> to vector<1x32xf32>
    %483 = vector.broadcast %482 : vector<1x32xf32> to vector<16x32xf32>
    %484 = arith.addf %481, %483 : vector<16x32xf32>
    %cst_202 = arith.constant 0.000000e+00 : f32
    %485 = vector.broadcast %cst_202 : f32 to vector<16x32xf32>
    %486 = arith.maximumf %484, %485 : vector<16x32xf32>
    %c3_203 = arith.constant 3 : index
    %c0_204 = arith.constant 0 : index
    %c0_205 = arith.constant 0 : index
    %487 = vector.load %arg6[%c3_203, %c0_204, %c0_205] : memref<4x32x32xf32, #tpu.memory_space<vmem>>, vector<1x32x32xf32>
    %488 = vector.shape_cast %487 : vector<1x32x32xf32> to vector<32x32xf32>
    %cst_206 = arith.constant dense<0.000000e+00> : vector<16x32xf32>
    %489 = tpu.matmul %486, %488, %cst_206 {dimension_numbers = #tpu.dot_dimension_numbers<[1], [0], [0], [1], [0, 0, 1, 1], [], []>} : vector<16x32xf32>, vector<32x32xf32>, vector<16x32xf32> -> vector<16x32xf32>
    %490 = vector.extract_strided_slice %265 {offsets = [7, 0], sizes = [1, 32], strides = [1, 1]} : vector<10x32xf32> to vector<1x32xf32>
    %491 = vector.broadcast %490 : vector<1x32xf32> to vector<16x32xf32>
    %492 = arith.addf %489, %491 : vector<16x32xf32>
    %493 = arith.addf %478, %492 : vector<16x32xf32>
    %494 = vector.extract_strided_slice %265 {offsets = [8, 0], sizes = [1, 32], strides = [1, 1]} : vector<10x32xf32> to vector<1x32xf32>
    %495 = vector.extract_strided_slice %265 {offsets = [9, 0], sizes = [1, 32], strides = [1, 1]} : vector<10x32xf32> to vector<1x32xf32>
    %cst_207 = arith.constant dense<0.000000e+00> : vector<16xf32>
    %496 = vector.multi_reduction <add>, %493, %cst_207 [1] : vector<16x32xf32> to vector<16xf32>
    %497 = vector.shape_cast %496 : vector<16xf32> to vector<16x1xf32>
    %cst_208 = arith.constant 3.200000e+01 : f32
    %498 = vector.broadcast %cst_208 : f32 to vector<16x1xf32>
    %499 = arith.divf %497, %498 : vector<16x1xf32>
    %500 = vector.broadcast %499 : vector<16x1xf32> to vector<16x32xf32>
    %501 = arith.subf %493, %500 : vector<16x32xf32>
    %502 = vector.broadcast %499 : vector<16x1xf32> to vector<16x32xf32>
    %503 = arith.subf %493, %502 : vector<16x32xf32>
    %504 = arith.mulf %501, %503 : vector<16x32xf32>
    %cst_209 = arith.constant dense<0.000000e+00> : vector<16xf32>
    %505 = vector.multi_reduction <add>, %504, %cst_209 [1] : vector<16x32xf32> to vector<16xf32>
    %506 = vector.shape_cast %505 : vector<16xf32> to vector<16x1xf32>
    %cst_210 = arith.constant 3.200000e+01 : f32
    %507 = vector.broadcast %cst_210 : f32 to vector<16x1xf32>
    %508 = arith.divf %506, %507 : vector<16x1xf32>
    %509 = vector.broadcast %499 : vector<16x1xf32> to vector<16x32xf32>
    %510 = arith.subf %493, %509 : vector<16x32xf32>
    %cst_211 = arith.constant 9.99999974E-6 : f32
    %511 = vector.broadcast %cst_211 : f32 to vector<16x1xf32>
    %512 = arith.addf %508, %511 : vector<16x1xf32>
    %513 = math.rsqrt %512 : vector<16x1xf32>
    %514 = vector.broadcast %513 : vector<16x1xf32> to vector<16x32xf32>
    %515 = arith.mulf %510, %514 : vector<16x32xf32>
    %516 = vector.broadcast %494 : vector<1x32xf32> to vector<16x32xf32>
    %517 = arith.mulf %515, %516 : vector<16x32xf32>
    %518 = vector.broadcast %495 : vector<1x32xf32> to vector<16x32xf32>
    %519 = arith.addf %517, %518 : vector<16x32xf32>
    %c0_212 = arith.constant 0 : index
    %c0_213 = arith.constant 0 : index
    %520 = vector.load %arg8[%c0_212, %c0_213] : memref<16x32xf32, #tpu.memory_space<vmem>>, vector<16x32xf32>
    tpu.vector_store %arg8[%c0_212, %c0_213], %519 {strides = array<i32>} : memref<16x32xf32, #tpu.memory_space<vmem>>, vector<16x32xf32>,
    return
  }
}

</mosaic_0001>

<bundles_post_ra>
// kernel: tpu_custom_call.1
= control target key start
LH: loop header
LB: loop body
LE: loop exit
PB: predicated region body
PF: predicated region fallthrough
CT: control target
= control target key end

     0   :  { %13 = vsyncpa [#allocation3], 0  ;;  %s6639_s0 = inlined_call_operand.vmem [shape: f32[16,4], index: 0, kind: input, shape index: {}]   ;;  %s6640_s1 = inlined_call_operand.hbm [shape: f32[16,32], index: 1, kind: input, shape index: {}]   ;;  %s6641_s2 = inlined_call_operand.vmem [shape: f32[4,32], index: 2, kind: input, shape index: {}]   ;;  %s6642_s3 = inlined_call_operand.vmem [shape: f32[1,32], index: 3, kind: input, shape index: {}]   ;;  %s6643_s4 = inlined_call_operand.hbm [shape: f32[6,32,32], index: 4, kind: input, shape index: {}]   ;;  %s6644_s5 = inlined_call_operand.vmem [shape: f32[8,8,32], index: 5, kind: input, shape index: {}]   ;;  %s6645_s6 = inlined_call_operand.hbm [shape: f32[4,32,32], index: 6, kind: input, shape index: {}]   ;;  %s6646_s7 = inlined_call_operand.vmem [shape: f32[2,10,32], index: 7, kind: input, shape index: {}]   ;;  %s6647_s8 = inlined_call_operand.hbm [shape: f32[16,32], index: 8, kind: output, shape index: {}]  }
   0x1   :  { %14 = vsyncpa [#allocation6], 0 }
   0x2   :  { %15 = vsyncpa [#allocation4], 0  ;;  %s5956_s27 = smov [#allocation5]   ;;  %s5957_s29 = smov [#allocation2]  }
   0x3   :  { %s39_s28 = sshll.u32 %s5956_s27, 4  ;;  %s23_s30 = sshll.u32 %s5957_s29, 4  ;;  %s40_s28 = int_to_ptr.vmem [resolvable:$true] %s39_s28  ;;  %s6012_s30 = int_to_ptr.vmem [resolvable:$true] %s23_s30 }
   0x4   :  { %s5862_s11 = scalar_lea.hbm %s6643_s4, 3072 }
   0x5   :  { %p5863_p0 = scmp.ne.s32.totalorder %s6643_s4, %s5862_s11  ;;  %p5866_p1 = scmp.lt.u32.totalorder %s5862_s11, %s6643_s4 }
   0x7   :  { %p5868_p2 = pnand %p5866_p1, %p5863_p0 }
   0x9   :  { %5871 = shalt.err (!%p5868_p2)
}
   0xa   :  { %s5872_s16 = scalar_lea.vmem %s40_s28, 3072  ;;  %p5877_p4 = scmp.lt.s32.totalorder %s40_s28, %s40_s28 }
   0xb   :  { %p5873_p3 = scmp.ne.s32.totalorder %s40_s28, %s5872_s16  ;;  %p5878_p5 = scmp.lt.s32.totalorder %s5872_s16, %s5872_s16 }
   0xd   :  { %p5879_p6 = por %p5878_p5, %p5877_p4 }
   0xf   :  { %p5880_p7 = pnand %p5879_p6, %p5873_p3 }
  0x11   :  { %5883 = shalt.err (!%p5880_p7)
}
  0x12   :  { %s5958_s17 = smov 128   ;;  %s5959_s18 = smov 8  }
  0x13   :  { %45 = dma.hbm_to_vmem [thread:$0]  %s6643_s4, 3072, %s40_s28, [#allocation6], %s5958_s17, %s5958_s17, %s5959_s18  }
  0x14   :  { %s5884_s23 = scalar_lea.hbm %s6640_s1, 256 }
  0x15   :  { %p5885_p8 = scmp.ne.s32.totalorder %s6640_s1, %s5884_s23  ;;  %p5888_p9 = scmp.lt.u32.totalorder %s5884_s23, %s6640_s1 }
  0x17   :  { %p5890_p10 = pnand %p5888_p9, %p5885_p8 }
  0x19   :  { %5893 = shalt.err (!%p5890_p10)
}
  0x1a   :  { %s5894_s29 = scalar_lea.vmem %s6012_s30, 256  ;;  %p5899_p12 = scmp.lt.s32.totalorder %s6012_s30, %s6012_s30 }
  0x1b   :  { %p5895_p11 = scmp.ne.s32.totalorder %s6012_s30, %s5894_s29  ;;  %p5900_p13 = scmp.lt.s32.totalorder %s5894_s29, %s5894_s29 }
  0x1d   :  { %p5901_p0 = por %p5900_p13, %p5899_p12 }
  0x1f   :  { %p5902_p1 = pnand %p5901_p0, %p5895_p11 }
  0x21   :  { %5905 = shalt.err (!%p5902_p1)
}
  0x22   :  { %29 = dma.hbm_to_vmem [thread:$0]  %s6640_s1, 256, %s6012_s30, [#allocation3], %s5958_s17, %s5958_s17, %s5959_s18  }
  0x23   :  { %s5960_s9 = smov [#allocation7]   ;;  %s5906_s13 = scalar_lea.hbm %s6645_s6, 2048 }
  0x24   :  { %s53_s10 = sshll.u32 %s5960_s9, 4  ;;  %p5907_p2 = scmp.ne.s32.totalorder %s6645_s6, %s5906_s13  ;;  %s54_s10 = int_to_ptr.vmem [resolvable:$true] %s53_s10 }
  0x25   :  { %p5910_p3 = scmp.lt.u32.totalorder %s5906_s13, %s6645_s6 }
  0x27   :  { %p5912_p4 = pnand %p5910_p3, %p5907_p2 }
  0x29   :  { %5915 = shalt.err (!%p5912_p4)
}
  0x2a   :  { %s5916_s20 = scalar_lea.vmem %s54_s10, 2048  ;;  %p5921_p6 = scmp.lt.s32.totalorder %s54_s10, %s54_s10 }
  0x2b   :  { %p5917_p5 = scmp.ne.s32.totalorder %s54_s10, %s5916_s20  ;;  %p5922_p7 = scmp.lt.s32.totalorder %s5916_s20, %s5916_s20 }
  0x2d   :  { %p5923_p8 = por %p5922_p7, %p5921_p6 }
  0x2f   :  { %p5924_p9 = pnand %p5923_p8, %p5917_p5 }
  0x31   :  { %5927 = shalt.err (!%p5924_p9)
}
  0x32   :  { %59 = dma.hbm_to_vmem [thread:$0]  %s6645_s6, 2048, %s54_s10, [#allocation6], %s5958_s17, %s5958_s17, %s5959_s18  }
  0x33   :  { %5950 = dma.done.wait [#allocation3], 256  }
  0x34   :  { %5951 = vsyncadd [#allocation3], 4294967040 }
  0x35   :  { %5952 = dma.done.wait [#allocation6], 5120  }
  0x36   :  { %5953 = vsyncadd [#allocation6], 4294962176  ;;  %vm88_vm0 = vcmask 1043456   ;;  %vm81_vm1 = vcmask 31744   ;;  %v73_v0 = vld [vmem:[%s6641_s2] sm:$0xf]  ;;  %v177_v31 = vlaneseq }
  0x37   :  { %v71_v1 = vld [vmem:[%s6639_s0] sm:$0xff]  ;;  %v72_v2 = vld [vmem:[%s6639_s0 + $0x8] sm:$0xff]  ;;  %5336 = vmatprep.subr.msk.mxu0 %vm88_vm0, %v73_v0  ;;  %v174_v4 = vld [vmem:[#allocation5 + $0x8] sm:$0xff]  ;;  %vm181_vm2 = vcmask 261120   ;;  %v5961_v30 = vmov 0.0   ;;  %vm5962_vm3 = vmmov 0  }
  0x38   :  { %5338 = vmatprep.mubr.msk.f32.mxu0 %vm81_vm1, %v71_v1  ;;  %v173_v3 = vld [vmem:[#allocation5] sm:$0xff]  ;;  %5337 = vmatpush3.msk.msra.mxu0 %vm88_vm0, %v73_v0  ;;  %v265_v7 = vld [vmem:[#allocation5 + $0x28] sm:$0xff]  ;;  %v175_v9 = vld [vmem:[#allocation5 + $0x10] sm:$0xff]  ;;  %v6098_v32 = vshrl.u32 %v177_v31, 7  ;;  %vm431_vm4 = vcmask 64512   ;;  %s5963_s27 = smov 120  }
  0x39   :  { %v264_v5 = vld [vmem:[#allocation5 + $0x20] sm:$0xff]  ;;  %v5691_v6 = vpack.c.bf16 %v174_v4, %v173_v3  ;;  %5339 = vmatmul.mubr.msk.f32.vlgmr.msra.gmra.mrb[0].mxu0 %vm81_vm1, %v72_v2  ;;  %v176_v10 = vld [vmem:[#allocation5 + $0x18] sm:$0xff]  ;;  %v266_v12 = vld [vmem:[#allocation5 + $0x30] sm:$0xff]  ;;  %s5964_s29 = smov 112   ;;  %s5965_s4 = smov 104  }
  0x3a   :  { %v5699_v8 = vpack.c.bf16 %v265_v7, %v264_v5  ;;  %v5695_v11 = vpack.c.bf16 %v176_v10, %v175_v9  ;;  %v267_v13 = vld [vmem:[#allocation5 + $0x38] sm:$0xff]  ;;  %v348_v15 = vld [vmem:[#allocation5 + $0x40] sm:$0xff]  ;;  %v349_v16 = vld [vmem:[#allocation5 + $0x48] sm:$0xff]  ;;  %v6101_v33 = vsub.s32 0, %v6098_v32  ;;  %v6104_v34 = vsub.s32 1, %v6098_v32 }
  0x3b   :  { %5692 = vmatprep.subr.bf16.mxu1 %v5691_v6  ;;  %v5703_v14 = vpack.c.bf16 %v267_v13, %v266_v12  ;;  %v5707_v17 = vpack.c.bf16 %v349_v16, %v348_v15  ;;  %v5080_v18 = vld [vmem:[%s6642_s3] ss:$0 sm:$0xff]  ;;  %v167_v22 = vld [vmem:[#allocation2] sm:$0xff]  ;;  %v354_v44 = vsub.s32 2, %v6098_v32  ;;  %s5966_s3 = smov [#allocation8]  }
  0x3c   :  { %5694 = vmatpush3.bf16.msra.mxu1 %v5691_v6  ;;  %5700 = vmatprep.subr.bf16.mxu0 %v5699_v8  ;;  %v168_v23 = vld [vmem:[#allocation2 + $0x8] sm:$0xff]  ;;  %v350_v25 = vld [vmem:[#allocation5 + $0x50] sm:$0xff]  ;;  %s5067_s6 = sshll.u32 %s5966_s3, 4  ;;  %s5068_s6 = int_to_ptr.vmem [resolvable:$true] %s5067_s6 }
  0x3d   :  { %5702 = vmatpush3.bf16.msra.mxu0 %v5699_v8  ;;  %5696 = vmatprep.subr.bf16.mxu1 %v5695_v11  ;;  %v351_v26 = vld [vmem:[#allocation5 + $0x58] sm:$0xff]  ;;  %p5933_p11 = scmp.lt.s32.totalorder %s5068_s6, %s5068_s6 }
  0x3e   :  { %5704 = vmatprep.subr.bf16.mxu0 %v5703_v14  ;;  %v5711_v29 = vpack.c.bf16 %v351_v26, %v350_v25  ;;  %v6109_v35 = vld [vmem:[%s6646_s7] sm:$0xff] }
  0x3f   :  { %v180_v36 = vrot.slane %v6109_v35, %v6101_v33  ;;  %v271_v37 = vrot.slane %v6109_v35, %v6104_v34  ;;  %v355_v47 = vrot.slane %v6109_v35, %v354_v44  ;;  %v6171_v16 = vld [vmem:[%s6644_s5] sm:$0xff] }
  0x40   :  { %5698 = vmatpush3.bf16.msra.mxu1 %v5695_v11  ;;  %v6163_v11 = vld [vmem:[%s6644_s5 + $0x8] sm:$0xff] }
  0x41   :  { %5706 = vmatpush3.bf16.msra.mxu0 %v5703_v14  ;;  %5708 = vmatprep.subr.bf16.mxu1 %v5707_v17 }
  0x42   :  { %5374 = vmatprep.subr.mxu0 %v5961_v30 }
 0x10c   :  { %v5340_v19 = vpop.f32.mrb[0].mxu0 }
 0x10d   :  { %v164_v20 = vadd.f32 %v5340_v19, %v5080_v18  ;;  %v158_v21 = vpop.f32.mrb[1].mxu0 }
 0x10e   :  { %v159_v24 = vadd.f32 %v5080_v18, %v158_v21 }
 0x10f   :  { %v6078_v28 = vadd.f32 %v168_v23, %v164_v20 }
 0x110   :  { %v6076_v27 = vadd.f32 %v167_v22, %v159_v24 }
 0x112   :  { %5349 = vmatprep.mubr.msk.f32.mxu1 %vm181_vm2, %v6076_v27  ;;  %5360 = vmatprep.mubr.msk.f32.mxu0 %vm181_vm2, %v6076_v27 }
 0x113   :  { %5350 = vmatmul.mubr.msk.f32.vlgmr.msra.gmra.mrb[0].mxu1 %vm181_vm2, %v6078_v28  ;;  %5361 = vmatmul.mubr.msk.f32.vlgmr.msra.gmra.mrb[2].mxu0 %vm181_vm2, %v6078_v28 }
 0x114   :  { %5710 = vmatpush3.bf16.msra.mxu1 %v5707_v17  ;;  %5371 = vmatprep.mubr.msk.f32.mxu1 %vm181_vm2, %v6076_v27 }
 0x115   :  { %5712 = vmatprep.subr.bf16.mxu1 %v5711_v29  ;;  %5376 = vmatprep.mubr.msk.f32.mxu0 %vm5962_vm3, %v5961_v30 }
 0x118   :  { %5714 = vmatpush3.bf16.msra.mxu1 %v5711_v29 }
 0x119   :  { %5384 = vmatprep.subr.mxu1 %v5961_v30 }
 0x11b   :  { %5372 = vmatmul.mubr.msk.f32.vlgmr.msra.gmra.mrb[2].mxu1 %vm181_vm2, %v6078_v28 }
 0x11c   :  { %5386 = vmatprep.mubr.msk.f32.mxu1 %vm5962_vm3, %v5961_v30 }
 0x1e6   :  { %v5351_v38 = vpop.f32.mrb[0].mxu1  ;;  %v5362_v39 = vpop.f32.mrb[2].mxu0 }
 0x1e7   :  { %v6115_v40 = vadd.f32 %v5351_v38, %v180_v36  ;;  %v6117_v41 = vadd.f32 %v5362_v39, %v271_v37  ;;  %v254_v42 = vpop.f32.mrb[1].mxu1  ;;  %v338_v43 = vpop.f32.mrb[3].mxu0 }
 0x1e8   :  { %v339_v45 = vadd.f32 %v338_v43, %v271_v37  ;;  %v6122_v46 = vadd.f32 %v254_v42, %v180_v36 }
 0x1ea   :  { %596 = vrot.lane.b32.xlu0 %v339_v45, %s5963_s27  ;;  %5375 = vmatpush3.xpose.msk.msra.mxu0 %vm431_vm4, %v339_v45 }
 0x1eb   :  { %5379 = vmatprep.subr.mxu0 %v5961_v30 }
 0x1ed   :  { %5377 = vmatmul.mubr.msk.f32.vlgmr.msra.gmra.mrb[4].mxu0 %vm431_vm4, %v6122_v46 }
 0x1ee   :  { %v5373_v48 = vpop.f32.mrb[2].mxu1  ;;  %594 = vrot.lane.b32.xlu0 %v6122_v46, %s5963_s27  ;;  %5381 = vmatprep.mubr.msk.f32.mxu0 %vm5962_vm3, %v5961_v30 }
 0x1ef   :  { %v6134_v49 = vadd.f32 %v5373_v48, %v355_v47  ;;  %v422_v50 = vpop.f32.mrb[3].mxu1 }
 0x1f0   :  { %v6136_v51 = vadd.f32 %v422_v50, %v355_v47  ;;  %v6201_v50 = vld [vmem:[%s6644_s5 + $0x10] sm:$0xff] }
 0x1f2   :  { %5380 = vmatpush3.msra.mxu0 %v6136_v51 }
 0x1f3   :  { %5389 = vmatprep.subr.mxu0 %v5961_v30 }
 0x25c   :  { %v597_v52 = vpop.permute.xlu0 %596 }
 0x25d   :  { %5385 = vmatpush3.xpose.msk.msra.mxu1 %vm431_vm4, %v597_v52 }
 0x25e   :  { %5394 = vmatprep.subr.mxu1 %v5961_v30 }
 0x260   :  { %v595_v53 = vpop.permute.xlu0 %594 }
 0x261   :  { %5387 = vmatmul.mubr.msk.f32.vlgmr.msra.gmra.mrb[4].mxu1 %vm431_vm4, %v595_v53 }
 0x262   :  { %5396 = vmatprep.mubr.msk.f32.mxu1 %vm5962_vm3, %v5961_v30  ;;  %5395 = vmatpush3.msra.mxu1 %v6163_v11 }
 0x263   :  { %5404 = vmatprep.subr.mxu1 %v5961_v30 }
 0x2c0   :  { %v504_v54 = vpop.f32.mrb[4].mxu0 }
 0x2c1   :  { %v508_v55 = vmul.f32 0.35355338, %v504_v54  ;;  %v5378_v56 = vpop.f32.mrb[5].mxu0 }
 0x2c3   :  { %v509_v57 = vsel %vm431_vm4, %v508_v55, -inf }
 0x2c4   :  { %510 = vmax.xlane.f32.xlu1 %v509_v57 }
 0x334   :  { %v668_v58 = vpop.f32.mrb[4].mxu1 }
 0x335   :  { %v672_v59 = vmul.f32 0.35355338, %v668_v58  ;;  %v5388_v60 = vpop.f32.mrb[5].mxu1 }
 0x337   :  { %v673_v61 = vsel %vm431_vm4, %v672_v59, -inf }
 0x338   :  { %674 = vmax.xlane.f32.xlu1 %v673_v61 }
 0x351   :  { %v511_v62 = vpop.xlane.xlu1 %510 }
 0x352   :  { %v512_v63 = vsub.f32 %v508_v55, %v511_v62 }
 0x354   :  { %v513_v0 = vmul.f32 1.442695, %v512_v63 }
 0x356   :  { %5782 = vpow2.f32 %v513_v0 }
 0x360   :  { %v5783_v1 = vpop.eup %5782 }
 0x361   :  { %v515_v2 = vsel %vm431_vm4, %v5783_v1, 0.0 }
 0x362   :  { %516 = vadd.xlane.f32.xlu0 %v515_v2 }
 0x378   :  { %999 = vrot.lane.b32.xlu0 %v6136_v51, %s5964_s29 }
 0x37c   :  { %1153 = vrot.lane.b32.xlu0 %v339_v45, %s5965_s4 }
 0x3c5   :  { %v675_v3 = vpop.xlane.xlu1 %674 }
 0x3c6   :  { %v676_v4 = vsub.f32 %v672_v59, %v675_v3  ;;  %v6224_v3 = vld [vmem:[%s6644_s5 + $0x18] sm:$0xff] }
 0x3c8   :  { %v677_v5 = vmul.f32 1.442695, %v676_v4 }
 0x3ca   :  { %5784 = vpow2.f32 %v677_v5 }
 0x3d4   :  { %v5785_v6 = vpop.eup %5784 }
 0x3d5   :  { %v679_v7 = vsel %vm431_vm4, %v5785_v6, 0.0 }
 0x3d6   :  { %680 = vadd.xlane.f32.xlu1 %v679_v7 }
 0x3e7   :  { %685 = vrot.lane.b32.xlu1 %v6136_v51, %s5963_s27 }
 0x3eb   :  { %911 = vrot.lane.b32.xlu1 %v339_v45, %s5964_s29 }
 0x3ef   :  { %v517_v8 = vpop.xlane.xlu0 %516  ;;  %909 = vrot.lane.b32.xlu1 %v6122_v46, %s5964_s29 }
 0x3f0   :  { %5786 = vrcp.f32 %v517_v8 }
 0x3f3   :  { %v1000_v18 = vpop.permute.xlu0 %999 }
 0x3fa   :  { %v5787_v9 = vpop.eup %5786 }
 0x3fb   :  { %v519_v10 = vmul.f32 %v5787_v9, %v5783_v1 }
 0x3fd   :  { %5382 = vmatmul.mubr.msk.f32.vlgmr.msra.gmra.mrb[6].mxu0 %vm431_vm4, %v519_v10 }
 0x3fe   :  { %5391 = vmatprep.mubr.msk.f32.mxu0 %vm5962_vm3, %v5961_v30 }
 0x463   :  { %v681_v12 = vpop.xlane.xlu1 %680 }
 0x464   :  { %5788 = vrcp.f32 %v681_v12 }
 0x467   :  { %v686_v13 = vpop.permute.xlu1 %685 }
 0x468   :  { %5390 = vmatpush3.msra.mxu0 %v686_v13 }
 0x469   :  { %5399 = vmatprep.subr.mxu0 %v5961_v30 }
 0x46b   :  { %v912_v20 = vpop.permute.xlu1 %911 }
 0x46e   :  { %v5789_v14 = vpop.eup %5788 }
 0x46f   :  { %v683_v15 = vmul.f32 %v5789_v14, %v5785_v6  ;;  %v910_v23 = vpop.permute.xlu1 %909 }
 0x471   :  { %5392 = vmatmul.mubr.msk.f32.vlgmr.msra.gmra.mrb[8].mxu0 %vm431_vm4, %v683_v15 }
 0x472   :  { %5400 = vmatpush3.msra.mxu0 %v6171_v16  ;;  %5401 = vmatprep.mubr.msk.f32.mxu0 %vm5962_vm3, %v5961_v30 }
 0x473   :  { %5409 = vmatprep.subr.mxu0 %v5961_v30 }
 0x4d0   :  { %v589_v17 = vpop.f32.mrb[6].mxu0 }
 0x4d1   :  { %v5383_v19 = vpop.f32.mrb[7].mxu0  ;;  %5402 = vmatmul.mubr.msk.f32.vlgmr.msra.gmra.mrb[10].mxu0 %vm431_vm4, %v589_v17 }
 0x4d2   :  { %5410 = vmatpush3.msra.mxu0 %v1000_v18  ;;  %5411 = vmatprep.mubr.msk.f32.mxu0 %vm5962_vm3, %v5961_v30 }
 0x4d3   :  { %5419 = vmatprep.subr.mxu0 %v5961_v30 }
 0x544   :  { %v757_v21 = vpop.f32.mrb[8].mxu0 }
 0x545   :  { %v5393_v22 = vpop.f32.mrb[9].mxu0  ;;  %5397 = vmatmul.mubr.msk.f32.vlgmr.msra.gmra.mrb[6].mxu1 %vm431_vm4, %v757_v21 }
 0x546   :  { %5405 = vmatpush3.xpose.msk.msra.mxu1 %vm431_vm4, %v912_v20  ;;  %5406 = vmatprep.mubr.msk.f32.mxu1 %vm5962_vm3, %v5961_v30 }
 0x547   :  { %5414 = vmatprep.subr.mxu1 %v5961_v30 }
 0x549   :  { %5407 = vmatmul.mubr.msk.f32.vlgmr.msra.gmra.mrb[8].mxu1 %vm431_vm4, %v910_v23 }
 0x54a   :  { %5416 = vmatprep.mubr.msk.f32.mxu1 %vm5962_vm3, %v5961_v30  ;;  %5415 = vmatpush3.msra.mxu1 %v6201_v50 }
 0x54b   :  { %5424 = vmatprep.subr.mxu1 %v5961_v30 }
 0x5a4   :  { %v905_v24 = vpop.f32.mrb[10].mxu0 }
 0x5a5   :  { %v5403_v25 = vpop.f32.mrb[11].mxu0 }
 0x618   :  { %v832_v26 = vpop.f32.mrb[6].mxu1 }
 0x619   :  { %v906_v29 = vadd.f32 %v905_v24, %v832_v26  ;;  %v5398_v31 = vpop.f32.mrb[7].mxu1 }
 0x61c   :  { %v983_v36 = vpop.f32.mrb[8].mxu1 }
 0x61d   :  { %v987_v37 = vmul.f32 0.35355338, %v983_v36  ;;  %v5408_v38 = vpop.f32.mrb[9].mxu1 }
 0x61f   :  { %v988_v39 = vsel %vm431_vm4, %v987_v37, -inf }
 0x620   :  { %989 = vmax.xlane.f32.xlu1 %v988_v39 }
 0x631   :  { %1241 = vrot.lane.b32.xlu1 %v6136_v51, %s5965_s4  ;;  %v1154_v51 = vpop.permute.xlu0 %1153 }
 0x635   :  { %1556 = vrot.lane.b32.xlu1 %v6117_v41, %s5963_s27 }
 0x6ad   :  { %v990_v42 = vpop.xlane.xlu1 %989 }
 0x6ae   :  { %v991_v43 = vsub.f32 %v987_v37, %v990_v42 }
 0x6b0   :  { %v992_v45 = vmul.f32 1.442695, %v991_v43 }
 0x6b1   :  { %v1242_v56 = vpop.permute.xlu1 %1241 }
 0x6b2   :  { %5790 = vpow2.f32 %v992_v45 }
 0x6b5   :  { %v1557_v7 = vpop.permute.xlu1 %1556 }
 0x6bc   :  { %v5791_v47 = vpop.eup %5790 }
 0x6bd   :  { %v994_v48 = vsel %vm431_vm4, %v5791_v47, 0.0 }
 0x6be   :  { %995 = vadd.xlane.f32.xlu0 %v994_v48 }
 0x6d4   :  { %1151 = vrot.lane.b32.xlu0 %v6122_v46, %s5965_s4 }
 0x74b   :  { %v996_v52 = vpop.xlane.xlu0 %995 }
 0x74c   :  { %5792 = vrcp.f32 %v996_v52 }
 0x74f   :  { %v1152_v46 = vpop.permute.xlu0 %1151 }
 0x756   :  { %v5793_v53 = vpop.eup %5792 }
 0x757   :  { %v998_v54 = vmul.f32 %v5793_v53, %v5791_v47 }
 0x759   :  { %5412 = vmatmul.mubr.msk.f32.vlgmr.msra.gmra.mrb[12].mxu0 %vm431_vm4, %v998_v54 }
 0x75a   :  { %5420 = vmatpush3.xpose.msk.msra.mxu0 %vm431_vm4, %v1154_v51  ;;  %5421 = vmatprep.mubr.msk.f32.mxu0 %vm5962_vm3, %v5961_v30 }
 0x75b   :  { %5429 = vmatprep.subr.mxu0 %v5961_v30 }
 0x75d   :  { %5422 = vmatmul.mubr.msk.f32.vlgmr.msra.gmra.mrb[14].mxu0 %vm431_vm4, %v1152_v46 }
 0x75e   :  { %5431 = vmatprep.mubr.msk.f32.mxu0 %vm5962_vm3, %v5961_v30  ;;  %5430 = vmatpush3.msra.mxu0 %v6224_v3 }
 0x75f   :  { %5439 = vmatprep.subr.mxu0 %v5961_v30 }
 0x82c   :  { %v1071_v55 = vpop.f32.mrb[12].mxu0 }
 0x82d   :  { %v5413_v57 = vpop.f32.mrb[13].mxu0  ;;  %5417 = vmatmul.mubr.msk.f32.vlgmr.msra.gmra.mrb[10].mxu1 %vm431_vm4, %v1071_v55 }
 0x82e   :  { %5425 = vmatpush3.msra.mxu1 %v1242_v56  ;;  %5426 = vmatprep.mubr.msk.f32.mxu1 %vm5962_vm3, %v5961_v30 }
 0x82f   :  { %5434 = vmatprep.subr.mxu1 %v5961_v30 }
 0x830   :  { %v1225_v58 = vpop.f32.mrb[14].mxu0 }
 0x831   :  { %v1229_v59 = vmul.f32 0.35355338, %v1225_v58  ;;  %v5423_v60 = vpop.f32.mrb[15].mxu0 }
 0x833   :  { %v1230_v61 = vsel %vm431_vm4, %v1229_v59, -inf }
 0x834   :  { %1231 = vmax.xlane.f32.xlu0 %v1230_v61 }
 0x8c1   :  { %v1232_v62 = vpop.xlane.xlu0 %1231 }
 0x8c2   :  { %v1233_v63 = vsub.f32 %v1229_v59, %v1232_v62 }
 0x8c4   :  { %v1234_v0 = vmul.f32 1.442695, %v1233_v63 }
 0x8c6   :  { %5794 = vpow2.f32 %v1234_v0 }
 0x8d0   :  { %v5795_v1 = vpop.eup %5794 }
 0x8d1   :  { %v1236_v2 = vsel %vm431_vm4, %v5795_v1, 0.0 }
 0x8d2   :  { %1237 = vadd.xlane.f32.xlu1 %v1236_v2 }
 0x8e3   :  { %1554 = vrot.lane.b32.xlu1 %v6115_v40, %s5963_s27 }
 0x900   :  { %v1146_v4 = vpop.f32.mrb[10].mxu1 }
 0x901   :  { %v1150_v5 = vadd.f32 %v1146_v4, %v906_v29  ;;  %v5418_v6 = vpop.f32.mrb[11].mxu1 }
 0x95f   :  { %v1238_v8 = vpop.xlane.xlu1 %1237 }
 0x960   :  { %5796 = vrcp.f32 %v1238_v8 }
 0x963   :  { %v1555_v12 = vpop.permute.xlu1 %1554 }
 0x96a   :  { %v5797_v9 = vpop.eup %5796 }
 0x96b   :  { %v1240_v10 = vmul.f32 %v5797_v9, %v5795_v1 }
 0x96d   :  { %5427 = vmatmul.mubr.msk.f32.vlgmr.msra.gmra.mrb[12].mxu1 %vm431_vm4, %v1240_v10 }
 0x96e   :  { %5435 = vmatpush3.xpose.msk.msra.mxu1 %vm431_vm4, %v6117_v41  ;;  %5436 = vmatprep.mubr.msk.f32.mxu1 %vm5962_vm3, %v5961_v30 }
 0x96f   :  { %5444 = vmatprep.subr.mxu1 %v5961_v30 }
 0x971   :  { %5437 = vmatmul.mubr.msk.f32.vlgmr.msra.gmra.mrb[14].mxu1 %vm431_vm4, %v6115_v40 }
 0x972   :  { %5445 = vmatpush3.xpose.msk.msra.mxu1 %vm431_vm4, %v1557_v7  ;;  %5446 = vmatprep.mubr.msk.f32.mxu1 %vm5962_vm3, %v5961_v30 }
 0x973   :  { %5454 = vmatprep.subr.mxu1 %v5961_v30 }
 0x975   :  { %5447 = vmatmul.mubr.msk.f32.vlgmr.msra.gmra.mrb[16].mxu1 %vm431_vm4, %v1555_v12 }
 0x976   :  { %5455 = vmatpush3.msra.mxu1 %v6163_v11  ;;  %5456 = vmatprep.mubr.msk.f32.mxu1 %vm5962_vm3, %v5961_v30 }
 0x977   :  { %5464 = vmatprep.subr.mxu1 %v5961_v30 }
 0xa40   :  { %v1313_v13 = vpop.f32.mrb[12].mxu1 }
 0xa41   :  { %v5428_v14 = vpop.f32.mrb[13].mxu1  ;;  %5432 = vmatmul.mubr.msk.f32.vlgmr.msra.gmra.mrb[16].mxu0 %vm431_vm4, %v1313_v13 }
 0xa42   :  { %5440 = vmatpush3.msra.mxu0 %v6134_v49  ;;  %5441 = vmatprep.mubr.msk.f32.mxu0 %vm5962_vm3, %v5961_v30 }
 0xa43   :  { %5449 = vmatprep.subr.mxu0 %v5961_v30 }
 0xa44   :  { %v1465_v15 = vpop.f32.mrb[14].mxu1 }
 0xa45   :  { %v1469_v17 = vmul.f32 0.35355338, %v1465_v15  ;;  %v5438_v18 = vpop.f32.mrb[15].mxu1 }
 0xa47   :  { %v1470_v11 = vsel %vm431_vm4, %v1469_v17, -inf }
 0xa48   :  { %1471 = vmax.xlane.f32.xlu1 %v1470_v11  ;;  %v1628_v19 = vpop.f32.mrb[16].mxu1 }
 0xa49   :  { %v1632_v20 = vmul.f32 0.35355338, %v1628_v19  ;;  %v5448_v21 = vpop.f32.mrb[17].mxu1 }
 0xa4b   :  { %v1633_v22 = vsel %vm431_vm4, %v1632_v20, -inf }
 0xa4c   :  { %1634 = vmax.xlane.f32.xlu0 %v1633_v22 }
 0xa59   :  { %1867 = vrot.lane.b32.xlu1 %v6115_v40, %s5964_s29 }
 0xad5   :  { %v1472_v23 = vpop.xlane.xlu1 %1471 }
 0xad6   :  { %v1473_v24 = vsub.f32 %v1469_v17, %v1472_v23  ;;  %v2349_v23 = vsub.s32 3, %v6098_v32 }
 0xad8   :  { %v1474_v25 = vmul.f32 1.442695, %v1473_v24 }
 0xad9   :  { %v1635_v26 = vpop.xlane.xlu0 %1634 }
 0xada   :  { %5798 = vpow2.f32 %v1474_v25  ;;  %v1636_v29 = vsub.f32 %v1632_v20, %v1635_v26  ;;  %v2350_v25 = vrot.slane %v6109_v35, %v2349_v23 }
 0xadc   :  { %v1637_v31 = vmul.f32 1.442695, %v1636_v29 }
 0xade   :  { %5800 = vpow2.f32 %v1637_v31 }
 0xae4   :  { %v5799_v36 = vpop.eup %5798 }
 0xae5   :  { %v1476_v37 = vsel %vm431_vm4, %v5799_v36, 0.0 }
 0xae6   :  { %1477 = vadd.xlane.f32.xlu0 %v1476_v37 }
 0xae8   :  { %v5801_v38 = vpop.eup %5800 }
 0xae9   :  { %v1639_v39 = vsel %vm431_vm4, %v5801_v38, 0.0 }
 0xaea   :  { %1640 = vadd.xlane.f32.xlu0 %v1639_v39 }
 0xb00   :  { %1645 = vrot.lane.b32.xlu0 %v6134_v49, %s5963_s27 }
 0xb04   :  { %1869 = vrot.lane.b32.xlu0 %v6117_v41, %s5964_s29 }
 0xb14   :  { %v1388_v42 = vpop.f32.mrb[16].mxu0 }
 0xb15   :  { %v6260_v43 = vadd.f32 %v1388_v42, %v1150_v5  ;;  %v5433_v45 = vpop.f32.mrb[17].mxu0 }
 0xb17   :  { %v2351_v26 = vadd.f32 %v2350_v25, %v6260_v43 }
 0xb73   :  { %v1478_v47 = vpop.xlane.xlu0 %1477 }
 0xb74   :  { %5802 = vrcp.f32 %v1478_v47 }
 0xb77   :  { %v1641_v48 = vpop.xlane.xlu0 %1640 }
 0xb78   :  { %5804 = vrcp.f32 %v1641_v48 }
 0xb7b   :  { %v1646_v53 = vpop.permute.xlu0 %1645 }
 0xb7e   :  { %v5803_v51 = vpop.eup %5802 }
 0xb7f   :  { %v1480_v52 = vmul.f32 %v5803_v51, %v5799_v36  ;;  %v1870_v58 = vpop.permute.xlu0 %1869  ;;  %v2353_v36 = vadd.f32 %v2351_v26, %v6076_v27  ;;  %v2489_v26 = vld [vmem:[#allocation7 + $0x38] sm:$0xff] }
 0xb81   :  { %5442 = vmatmul.mubr.msk.f32.vlgmr.msra.gmra.mrb[18].mxu0 %vm431_vm4, %v1480_v52 }
 0xb82   :  { %v5805_v54 = vpop.eup %5804  ;;  %5450 = vmatpush3.msra.mxu0 %v1646_v53  ;;  %5451 = vmatprep.mubr.msk.f32.mxu0 %vm5962_vm3, %v5961_v30 }
 0xb83   :  { %v1643_v46 = vmul.f32 %v5805_v54, %v5801_v38  ;;  %5459 = vmatprep.subr.mxu0 %v5961_v30 }
 0xb85   :  { %5452 = vmatmul.mubr.msk.f32.vlgmr.msra.gmra.mrb[20].mxu0 %vm431_vm4, %v1643_v46 }
 0xb86   :  { %5460 = vmatpush3.msra.mxu0 %v6171_v16  ;;  %5461 = vmatprep.mubr.msk.f32.mxu0 %vm5962_vm3, %v5961_v30  ;;  %v1868_v16 = vpop.permute.xlu1 %1867 }
 0xb87   :  { %5469 = vmatprep.subr.mxu0 %v5961_v30 }
 0xc54   :  { %v1550_v55 = vpop.f32.mrb[18].mxu0 }
 0xc55   :  { %v5443_v56 = vpop.f32.mrb[19].mxu0  ;;  %5462 = vmatmul.mubr.msk.f32.vlgmr.msra.gmra.mrb[22].mxu0 %vm431_vm4, %v1550_v55  ;;  %v2384_v55 = vsub.s32 4, %v6098_v32 }
 0xc56   :  { %5471 = vmatprep.mubr.msk.f32.mxu0 %vm5962_vm3, %v5961_v30  ;;  %v2390_v56 = vsub.s32 5, %v6098_v32 }
 0xc58   :  { %v1717_v57 = vpop.f32.mrb[20].mxu0 }
 0xc59   :  { %v5453_v59 = vpop.f32.mrb[21].mxu0  ;;  %5457 = vmatmul.mubr.msk.f32.vlgmr.msra.gmra.mrb[18].mxu1 %vm431_vm4, %v1717_v57  ;;  %v2385_v57 = vrot.slane %v6109_v35, %v2384_v55 }
 0xc5a   :  { %5465 = vmatpush3.xpose.msk.msra.mxu1 %vm431_vm4, %v1870_v58  ;;  %5466 = vmatprep.mubr.msk.f32.mxu1 %vm5962_vm3, %v5961_v30 }
 0xc5b   :  { %5474 = vmatprep.subr.mxu1 %v5961_v30 }
 0xc5d   :  { %5467 = vmatmul.mubr.msk.f32.vlgmr.msra.gmra.mrb[20].mxu1 %vm431_vm4, %v1868_v16  ;;  %v2391_v16 = vrot.slane %v6109_v35, %v2390_v56 }
 0xc5e   :  { %5475 = vmatpush3.msra.mxu1 %v6201_v50  ;;  %5476 = vmatprep.mubr.msk.f32.mxu1 %vm5962_vm3, %v5961_v30 }
 0xc5f   :  { %5484 = vmatprep.subr.mxu1 %v5961_v30 }
 0xd28   :  { %v1863_v60 = vpop.f32.mrb[22].mxu0 }
 0xd29   :  { %v5463_v61 = vpop.f32.mrb[23].mxu0 }
 0xd2c   :  { %v1790_v62 = vpop.f32.mrb[18].mxu1 }
 0xd2d   :  { %v1864_v63 = vadd.f32 %v1863_v60, %v1790_v62  ;;  %v5458_v0 = vpop.f32.mrb[19].mxu1 }
 0xd30   :  { %v1941_v1 = vpop.f32.mrb[20].mxu1 }
 0xd31   :  { %v1945_v2 = vmul.f32 0.35355338, %v1941_v1  ;;  %v5468_v4 = vpop.f32.mrb[21].mxu1 }
 0xd33   :  { %v1946_v5 = vsel %vm431_vm4, %v1945_v2, -inf }
 0xd34   :  { %1947 = vmax.xlane.f32.xlu0 %v1946_v5 }
 0xd4a   :  { %1957 = vrot.lane.b32.xlu0 %v6134_v49, %s5964_s29 }
 0xd4e   :  { %2107 = vrot.lane.b32.xlu0 %v6115_v40, %s5965_s4 }
 0xdc1   :  { %v1948_v50 = vpop.xlane.xlu0 %1947 }
 0xdc2   :  { %v1949_v6 = vsub.f32 %v1945_v2, %v1948_v50 }
 0xdc4   :  { %v1950_v7 = vmul.f32 1.442695, %v1949_v6 }
 0xdc5   :  { %v1958_v8 = vpop.permute.xlu0 %1957 }
 0xdc6   :  { %5806 = vpow2.f32 %v1950_v7  ;;  %5470 = vmatpush3.msra.mxu0 %v1958_v8 }
 0xdc7   :  { %5479 = vmatprep.subr.mxu0 %v5961_v30 }
 0xdc9   :  { %v2108_v15 = vpop.permute.xlu0 %2107 }
 0xdd0   :  { %v5807_v9 = vpop.eup %5806 }
 0xdd1   :  { %v1952_v10 = vsel %vm431_vm4, %v5807_v9, 0.0 }
 0xdd2   :  { %1953 = vadd.xlane.f32.xlu1 %v1952_v10 }
 0xde3   :  { %2109 = vrot.lane.b32.xlu1 %v6117_v41, %s5965_s4 }
 0xe5f   :  { %v1954_v12 = vpop.xlane.xlu1 %1953 }
 0xe60   :  { %5808 = vrcp.f32 %v1954_v12  ;;  %v2394_v12 = vld [vmem:[#allocation7] sm:$0xff] }
 0xe63   :  { %v2110_v40 = vpop.permute.xlu1 %2109 }
 0xe6a   :  { %v5809_v13 = vpop.eup %5808 }
 0xe6b   :  { %v1956_v14 = vmul.f32 %v5809_v13, %v5807_v9  ;;  %v2395_v13 = vld [vmem:[#allocation7 + $0x8] sm:$0xff] }
 0xe6d   :  { %5472 = vmatmul.mubr.msk.f32.vlgmr.msra.gmra.mrb[24].mxu0 %vm431_vm4, %v1956_v14  ;;  %v5715_v14 = vpack.c.bf16 %v2395_v13, %v2394_v12  ;;  %v2711_v12 = vld [vmem:[#allocation5 + $0x90] sm:$0xff]  ;;  %v2712_v13 = vld [vmem:[#allocation5 + $0x98] sm:$0xff] }
 0xe6e   :  { %5480 = vmatpush3.xpose.msk.msra.mxu0 %vm431_vm4, %v2110_v40  ;;  %5481 = vmatprep.mubr.msk.f32.mxu0 %vm5962_vm3, %v5961_v30  ;;  %v2396_v40 = vld [vmem:[#allocation7 + $0x10] sm:$0xff] }
 0xe6f   :  { %5489 = vmatprep.subr.mxu0 %v5961_v30 }
 0xe71   :  { %5482 = vmatmul.mubr.msk.f32.vlgmr.msra.gmra.mrb[26].mxu0 %vm431_vm4, %v2108_v15  ;;  %v2397_v15 = vld [vmem:[#allocation7 + $0x18] sm:$0xff] }
 0xe72   :  { %5490 = vmatpush3.msra.mxu0 %v6224_v3  ;;  %5491 = vmatprep.mubr.msk.f32.mxu0 %vm5962_vm3, %v5961_v30 }
 0xf40   :  { %v2029_v41 = vpop.f32.mrb[24].mxu0 }
 0xf41   :  { %v5473_v17 = vpop.f32.mrb[25].mxu0  ;;  %5477 = vmatmul.mubr.msk.f32.vlgmr.msra.gmra.mrb[22].mxu1 %vm431_vm4, %v2029_v41  ;;  %v5719_v41 = vpack.c.bf16 %v2397_v15, %v2396_v40  ;;  %v2793_v40 = vld [vmem:[#allocation5 + $0xa0] sm:$0xff]  ;;  %v2794_v15 = vld [vmem:[#allocation5 + $0xa8] sm:$0xff] }
 0xf42   :  { %5486 = vmatprep.mubr.msk.f32.mxu1 %vm5962_vm3, %v5961_v30  ;;  %v2487_v17 = vld [vmem:[#allocation7 + $0x28] sm:$0xff] }
 0xf44   :  { %v2181_v18 = vpop.f32.mrb[26].mxu0 }
 0xf45   :  { %v2185_v11 = vmul.f32 0.35355338, %v2181_v18  ;;  %v5483_v19 = vpop.f32.mrb[27].mxu0 }
 0xf47   :  { %v2186_v20 = vsel %vm431_vm4, %v2185_v11, -inf }
 0xf48   :  { %2187 = vmax.xlane.f32.xlu0 %v2186_v20 }
 0xf5e   :  { %2197 = vrot.lane.b32.xlu0 %v6134_v49, %s5965_s4  ;;  %v2355_v49 = vsel %vm181_vm2, %v2353_v36, 0.0 }
 0xfd5   :  { %v2188_v3 = vpop.xlane.xlu0 %2187 }
 0xfd6   :  { %v2189_v21 = vsub.f32 %v2185_v11, %v2188_v3 }
 0xfd8   :  { %v2190_v22 = vmul.f32 1.442695, %v2189_v21 }
 0xfd9   :  { %v2198_v24 = vpop.permute.xlu0 %2197 }
 0xfda   :  { %5810 = vpow2.f32 %v2190_v22  ;;  %5485 = vmatpush3.msra.mxu1 %v2198_v24 }
 0xfdb   :  { %5716 = vmatprep.subr.bf16.mxu1 %v5715_v14 }
 0xfe4   :  { %v5811_v29 = vpop.eup %5810 }
 0xfe5   :  { %v2192_v31 = vsel %vm431_vm4, %v5811_v29, 0.0 }
 0xfe6   :  { %2193 = vadd.xlane.f32.xlu1 %v2192_v31  ;;  %v2400_v31 = vsub.s32 6, %v6098_v32 }
 0xfea   :  { %2356 = vadd.xlane.f32.xlu1 %v2355_v49 }
0x1014   :  { %v2102_v37 = vpop.f32.mrb[22].mxu1 }
0x1015   :  { %v2106_v38 = vadd.f32 %v2102_v37, %v1864_v63  ;;  %v5478_v39 = vpop.f32.mrb[23].mxu1 }
0x1073   :  { %v2194_v42 = vpop.xlane.xlu1 %2193 }
0x1074   :  { %5812 = vrcp.f32 %v2194_v42 }
0x1077   :  { %v2357_v45 = vpop.xlane.xlu1 %2356 }
0x1078   :  { %v2362_v47 = vmul.f32 0.03125, %v2357_v45 }
0x107a   :  { %v2364_v48 = vsub.f32 %v2353_v36, %v2362_v47  ;;  %v2401_v36 = vrot.slane %v6109_v35, %v2400_v31  ;;  %v2492_v47 = vsub.s32 7, %v6098_v32 }
0x107c   :  { %v2366_v51 = vmul.f32 %v2364_v48, %v2364_v48 }
0x107e   :  { %v5813_v52 = vpop.eup %5812  ;;  %v2368_v43 = vsel %vm181_vm2, %v2366_v51, 0.0 }
0x107f   :  { %v2196_v53 = vmul.f32 %v5813_v52, %v5811_v29  ;;  %2369 = vadd.xlane.f32.xlu0 %v2368_v43 }
0x1081   :  { %5487 = vmatmul.mubr.msk.f32.vlgmr.msra.gmra.mrb[24].mxu1 %vm431_vm4, %v2196_v53 }
0x1082   :  { %5718 = vmatpush3.bf16.msra.mxu1 %v5715_v14  ;;  %v5743_v14 = vpack.c.bf16 %v2712_v13, %v2711_v12 }
0x1083   :  { %5720 = vmatprep.subr.bf16.mxu1 %v5719_v41 }
0x1086   :  { %5722 = vmatpush3.bf16.msra.mxu1 %v5719_v41  ;;  %v5747_v41 = vpack.c.bf16 %v2794_v15, %v2793_v40 }
0x110c   :  { %v2370_v27 = vpop.xlane.xlu0 %2369 }
0x110d   :  { %v2374_v54 = vmul.f32 0.03125, %v2370_v27 }
0x110f   :  { %v2376_v46 = vadd.f32 1e-05, %v2374_v54 }
0x1111   :  { %5814 = vrsqrt.f32 %v2376_v46 }
0x111b   :  { %v5815_v58 = vpop.eup %5814 }
0x111c   :  { %v2380_v59 = vmul.f32 %v5815_v58, %v2364_v48  ;;  %v2493_v48 = vrot.slane %v6109_v35, %v2492_v47 }
0x111e   :  { %v2386_v60 = vmul.f32 %v2385_v57, %v2380_v59 }
0x1120   :  { %v6326_v61 = vadd.f32 %v2391_v16, %v2386_v60 }
0x1122   :  { %5502 = vmatprep.mubr.msk.f32.mxu1 %vm181_vm2, %v6326_v61 }
0x1154   :  { %v2269_v62 = vpop.f32.mrb[24].mxu1 }
0x1155   :  { %v5488_v63 = vpop.f32.mrb[25].mxu1  ;;  %5492 = vmatmul.mubr.msk.f32.vlgmr.msra.gmra.mrb[28].mxu0 %vm431_vm4, %v2269_v62 }
0x1228   :  { %v2342_v0 = vpop.f32.mrb[28].mxu0 }
0x1229   :  { %v2346_v1 = vadd.f32 %v2342_v0, %v2106_v38  ;;  %v5493_v2 = vpop.f32.mrb[29].mxu0 }
0x122a   :  { %v2619_v2 = vld [vmem:[#allocation5 + $0x60] sm:$0xff] }
0x122b   :  { %v2352_v4 = vadd.f32 %v2350_v25, %v2346_v1  ;;  %v2488_v25 = vld [vmem:[#allocation7 + $0x30] sm:$0xff] }
0x122c   :  { %v5727_v29 = vpack.c.bf16 %v2489_v26, %v2488_v25 }
0x122d   :  { %v2354_v5 = vadd.f32 %v2352_v4, %v6078_v28  ;;  %v2486_v28 = vld [vmem:[#allocation7 + $0x20] sm:$0xff]  ;;  %v2620_v4 = vld [vmem:[#allocation5 + $0x68] sm:$0xff] }
0x122e   :  { %v5723_v18 = vpack.c.bf16 %v2487_v17, %v2486_v28 }
0x122f   :  { %v2358_v50 = vsel %vm181_vm2, %v2354_v5, 0.0 }
0x1230   :  { %2359 = vadd.xlane.f32.xlu1 %v2358_v50  ;;  %5724 = vmatprep.subr.bf16.mxu0 %v5723_v18  ;;  %v2709_v50 = vld [vmem:[#allocation5 + $0x80] sm:$0xff] }
0x1231   :  { %5726 = vmatpush3.bf16.msra.mxu0 %v5723_v18 }
0x1232   :  { %5728 = vmatprep.subr.bf16.mxu0 %v5727_v29 }
0x1235   :  { %5730 = vmatpush3.bf16.msra.mxu0 %v5727_v29 }
0x12bd   :  { %v2360_v6 = vpop.xlane.xlu1 %2359 }
0x12be   :  { %v2363_v7 = vmul.f32 0.03125, %v2360_v6  ;;  %v2710_v6 = vld [vmem:[#allocation5 + $0x88] sm:$0xff] }
0x12c0   :  { %v2365_v8 = vsub.f32 %v2354_v5, %v2363_v7  ;;  %v5731_v5 = vpack.c.bf16 %v2620_v4, %v2619_v2  ;;  %v5739_v7 = vpack.c.bf16 %v2710_v6, %v2709_v50 }
0x12c2   :  { %v2367_v9 = vmul.f32 %v2365_v8, %v2365_v8  ;;  %5732 = vmatprep.subr.bf16.mxu1 %v5731_v5  ;;  %5740 = vmatprep.subr.bf16.mxu0 %v5739_v7 }
0x12c4   :  { %v2371_v10 = vsel %vm181_vm2, %v2367_v9, 0.0  ;;  %v2622_v9 = vld [vmem:[#allocation5 + $0x78] sm:$0xff] }
0x12c5   :  { %2372 = vadd.xlane.f32.xlu1 %v2371_v10 }
0x1352   :  { %v2373_v11 = vpop.xlane.xlu1 %2372 }
0x1353   :  { %v2375_v19 = vmul.f32 0.03125, %v2373_v11 }
0x1355   :  { %v2377_v20 = vadd.f32 1e-05, %v2375_v19 }
0x1357   :  { %5816 = vrsqrt.f32 %v2377_v20 }
0x1361   :  { %v5817_v3 = vpop.eup %5816 }
0x1362   :  { %v2381_v21 = vmul.f32 %v5817_v3, %v2365_v8  ;;  %v2621_v8 = vld [vmem:[#allocation5 + $0x70] sm:$0xff]  ;;  %v172_v3 = vld [vmem:[%s6646_s7 + $0x8] sm:$0x3] }
0x1363   :  { %v5735_v10 = vpack.c.bf16 %v2622_v9, %v2621_v8  ;;  %v2612_v25 = vrot.slane %v172_v3, %v6104_v34 }
0x1364   :  { %v2387_v22 = vmul.f32 %v2385_v57, %v2381_v21  ;;  %v2606_v21 = vrot.slane %v172_v3, %v6101_v33 }
0x1366   :  { %v2393_v24 = vadd.f32 %v2391_v16, %v2387_v22 }
0x1368   :  { %5503 = vmatmul.mubr.msk.f32.vlgmr.msra.gmra.mrb[26].mxu1 %vm181_vm2, %v2393_v24 }
0x1369   :  { %5734 = vmatpush3.bf16.msra.mxu1 %v5731_v5 }
0x136a   :  { %5736 = vmatprep.subr.bf16.mxu1 %v5735_v10 }
0x136d   :  { %5738 = vmatpush3.bf16.msra.mxu1 %v5735_v10 }
0x136e   :  { %5748 = vmatprep.subr.bf16.mxu1 %v5747_v41 }
0x143b   :  { %v5504_v49 = vpop.f32.mrb[26].mxu1 }
0x143c   :  { %v2480_v37 = vadd.f32 %v5504_v49, %v2401_v36  ;;  %v2474_v38 = vpop.f32.mrb[27].mxu1 }
0x143d   :  { %v2475_v39 = vadd.f32 %v2474_v38, %v2401_v36  ;;  %v2796_v38 = vld [vmem:[#allocation5 + $0xb8] sm:$0xff] }
0x143e   :  { %v2484_v45 = vmax.f32 %v2480_v37, 0.0  ;;  %v2795_v37 = vld [vmem:[#allocation5 + $0xb0] sm:$0xff] }
0x143f   :  { %v2483_v42 = vmax.f32 %v2475_v39, 0.0 }
0x1441   :  { %5513 = vmatprep.mubr.msk.f32.mxu0 %vm181_vm2, %v2483_v42 }
0x1442   :  { %5514 = vmatmul.mubr.msk.f32.vlgmr.msra.gmra.mrb[30].mxu0 %vm181_vm2, %v2484_v45  ;;  %v5751_v45 = vpack.c.bf16 %v2796_v38, %v2795_v37 }
0x1443   :  { %5742 = vmatpush3.bf16.msra.mxu0 %v5739_v7 }
0x1444   :  { %5744 = vmatprep.subr.bf16.mxu0 %v5743_v14 }
0x1447   :  { %5746 = vmatpush3.bf16.msra.mxu0 %v5743_v14 }
0x1448   :  { %5549 = vmatprep.subr.mxu0 %v5961_v30 }
0x1515   :  { %v5515_v51 = vpop.f32.mrb[30].mxu0 }
0x1516   :  { %v2566_v52 = vpop.f32.mrb[31].mxu0  ;;  %v2572_v43 = vadd.f32 %v5515_v51, %v2493_v48 }
0x1517   :  { %v2567_v53 = vadd.f32 %v2566_v52, %v2493_v48  ;;  %v6380_v48 = vld [vmem:[%s6646_s7 + $0x10] sm:$0xff] }
0x1518   :  { %v2576_v46 = vadd.f32 %v2572_v43, %v2393_v24  ;;  %v2626_v51 = vrot.slane %v6380_v48, %v6101_v33  ;;  %v2716_v52 = vrot.slane %v6380_v48, %v6104_v34 }
0x1519   :  { %v2575_v27 = vadd.f32 %v2567_v53, %v6326_v61 }
0x151a   :  { %v2580_v57 = vsel %vm181_vm2, %v2576_v46, 0.0 }
0x151b   :  { %v2577_v54 = vsel %vm181_vm2, %v2575_v27, 0.0 }
0x151c   :  { %2578 = vadd.xlane.f32.xlu1 %v2577_v54 }
0x1520   :  { %2581 = vadd.xlane.f32.xlu1 %v2580_v57 }
0x15a9   :  { %v2579_v58 = vpop.xlane.xlu1 %2578 }
0x15aa   :  { %v2583_v59 = vmul.f32 0.03125, %v2579_v58 }
0x15ac   :  { %v2585_v16 = vsub.f32 %v2575_v27, %v2583_v59 }
0x15ad   :  { %v2582_v60 = vpop.xlane.xlu1 %2581 }
0x15ae   :  { %v2584_v62 = vmul.f32 0.03125, %v2582_v60  ;;  %v2587_v63 = vmul.f32 %v2585_v16, %v2585_v16 }
0x15b0   :  { %v2586_v35 = vsub.f32 %v2576_v46, %v2584_v62  ;;  %v2589_v0 = vsel %vm181_vm2, %v2587_v63, 0.0 }
0x15b1   :  { %2590 = vadd.xlane.f32.xlu1 %v2589_v0 }
0x15b2   :  { %v2588_v1 = vmul.f32 %v2586_v35, %v2586_v35 }
0x15b4   :  { %v2592_v61 = vsel %vm181_vm2, %v2588_v1, 0.0 }
0x15b5   :  { %2593 = vadd.xlane.f32.xlu1 %v2592_v61 }
0x163e   :  { %v2591_v28 = vpop.xlane.xlu1 %2590 }
0x163f   :  { %v2595_v17 = vmul.f32 0.03125, %v2591_v28 }
0x1641   :  { %v2597_v18 = vadd.f32 1e-05, %v2595_v17 }
0x1642   :  { %v2594_v11 = vpop.xlane.xlu1 %2593 }
0x1643   :  { %5818 = vrsqrt.f32 %v2597_v18  ;;  %v2596_v19 = vmul.f32 0.03125, %v2594_v11 }
0x1645   :  { %v2598_v20 = vadd.f32 1e-05, %v2596_v19  ;;  %v6435_v19 = vld [vmem:[%s6644_s5 + $0x28] sm:$0xff] }
0x1647   :  { %5820 = vrsqrt.f32 %v2598_v20 }
0x164d   :  { %v5819_v22 = vpop.eup %5818 }
0x164e   :  { %v2601_v24 = vmul.f32 %v5819_v22, %v2585_v16  ;;  %v2800_v16 = vrot.slane %v6380_v48, %v354_v44 }
0x1650   :  { %v2607_v26 = vmul.f32 %v2606_v21, %v2601_v24  ;;  %v6443_v24 = vld [vmem:[%s6644_s5 + $0x20] sm:$0xff] }
0x1651   :  { %v5821_v29 = vpop.eup %5820 }
0x1652   :  { %v2602_v36 = vmul.f32 %v5821_v29, %v2586_v35  ;;  %v6356_v49 = vadd.f32 %v2612_v25, %v2607_v26 }
0x1654   :  { %v2608_v39 = vmul.f32 %v2606_v21, %v2602_v36  ;;  %5524 = vmatprep.mubr.msk.f32.mxu1 %vm181_vm2, %v6356_v49  ;;  %5535 = vmatprep.mubr.msk.f32.mxu0 %vm181_vm2, %v6356_v49 }
0x1656   :  { %v6362_v42 = vadd.f32 %v2612_v25, %v2608_v39 }
0x1658   :  { %5525 = vmatmul.mubr.msk.f32.vlgmr.msra.gmra.mrb[28].mxu1 %vm181_vm2, %v6362_v42  ;;  %5536 = vmatmul.mubr.msk.f32.vlgmr.msra.gmra.mrb[32].mxu0 %vm181_vm2, %v6362_v42 }
0x1659   :  { %5750 = vmatpush3.bf16.msra.mxu1 %v5747_v41  ;;  %5546 = vmatprep.mubr.msk.f32.mxu1 %vm181_vm2, %v6356_v49 }
0x165a   :  { %5752 = vmatprep.subr.bf16.mxu1 %v5751_v45  ;;  %5551 = vmatprep.mubr.msk.f32.mxu0 %vm5962_vm3, %v5961_v30 }
0x165d   :  { %5754 = vmatpush3.bf16.msra.mxu1 %v5751_v45 }
0x165e   :  { %5559 = vmatprep.subr.mxu1 %v5961_v30 }
0x1660   :  { %5547 = vmatmul.mubr.msk.f32.vlgmr.msra.gmra.mrb[30].mxu1 %vm181_vm2, %v6362_v42 }
0x1661   :  { %5561 = vmatprep.mubr.msk.f32.mxu1 %vm5962_vm3, %v5961_v30 }
0x172b   :  { %v5526_v43 = vpop.f32.mrb[28].mxu1  ;;  %v5537_v53 = vpop.f32.mrb[32].mxu0 }
0x172c   :  { %v6386_v27 = vadd.f32 %v5526_v43, %v2626_v51  ;;  %v6388_v54 = vadd.f32 %v5537_v53, %v2716_v52  ;;  %v2699_v46 = vpop.f32.mrb[29].mxu1  ;;  %v2783_v57 = vpop.f32.mrb[33].mxu0 }
0x172d   :  { %v6390_v58 = vadd.f32 %v2699_v46, %v2626_v51  ;;  %v6392_v59 = vadd.f32 %v2783_v57, %v2716_v52 }
0x172f   :  { %3041 = vrot.lane.b32.xlu1 %v6392_v59, %s5963_s27  ;;  %5550 = vmatpush3.xpose.msk.msra.mxu0 %vm431_vm4, %v6392_v59 }
0x1730   :  { %3039 = vrot.lane.b32.xlu0 %v6390_v58, %s5963_s27  ;;  %5554 = vmatprep.subr.mxu0 %v5961_v30 }
0x1732   :  { %5552 = vmatmul.mubr.msk.f32.vlgmr.msra.gmra.mrb[34].mxu0 %vm431_vm4, %v6390_v58 }
0x1733   :  { %v5548_v60 = vpop.f32.mrb[30].mxu1  ;;  %5556 = vmatprep.mubr.msk.f32.mxu0 %vm5962_vm3, %v5961_v30 }
0x1734   :  { %v6408_v62 = vadd.f32 %v5548_v60, %v2800_v16  ;;  %v2867_v63 = vpop.f32.mrb[31].mxu1 }
0x1735   :  { %v6410_v35 = vadd.f32 %v2867_v63, %v2800_v16 }
0x1737   :  { %5555 = vmatpush3.msra.mxu0 %v6410_v35 }
0x1738   :  { %5564 = vmatprep.subr.mxu0 %v5961_v30 }
0x17a1   :  { %v3042_v0 = vpop.permute.xlu1 %3041 }
0x17a2   :  { %5560 = vmatpush3.xpose.msk.msra.mxu1 %vm431_vm4, %v3042_v0  ;;  %v3040_v44 = vpop.permute.xlu0 %3039 }
0x17a3   :  { %5569 = vmatprep.subr.mxu1 %v5961_v30 }
0x17a5   :  { %5562 = vmatmul.mubr.msk.f32.vlgmr.msra.gmra.mrb[32].mxu1 %vm431_vm4, %v3040_v44 }
0x17a6   :  { %5571 = vmatprep.mubr.msk.f32.mxu1 %vm5962_vm3, %v5961_v30  ;;  %5570 = vmatpush3.msra.mxu1 %v6435_v19 }
0x17a7   :  { %5579 = vmatprep.subr.mxu1 %v5961_v30 }
0x1805   :  { %v2948_v1 = vpop.f32.mrb[34].mxu0 }
0x1806   :  { %v2952_v61 = vmul.f32 0.35355338, %v2948_v1  ;;  %v5553_v2 = vpop.f32.mrb[35].mxu0 }
0x1808   :  { %v2953_v4 = vsel %vm431_vm4, %v2952_v61, -inf }
0x1809   :  { %2954 = vmax.xlane.f32.xlu1 %v2953_v4 }
0x1878   :  { %v3113_v5 = vpop.f32.mrb[32].mxu1 }
0x1879   :  { %v3117_v50 = vmul.f32 0.35355338, %v3113_v5  ;;  %v5563_v6 = vpop.f32.mrb[33].mxu1 }
0x187b   :  { %v3118_v7 = vsel %vm431_vm4, %v3117_v50, -inf }
0x187c   :  { %3119 = vmax.xlane.f32.xlu0 %v3118_v7 }
0x1892   :  { %3356 = vrot.lane.b32.xlu0 %v6392_v59, %s5964_s29 }
0x1896   :  { %v2955_v8 = vpop.xlane.xlu1 %2954 }
0x1897   :  { %v2956_v9 = vsub.f32 %v2952_v61, %v2955_v8 }
0x1899   :  { %v2957_v10 = vmul.f32 1.442695, %v2956_v9 }
0x189b   :  { %5822 = vpow2.f32 %v2957_v10 }
0x18a5   :  { %v5823_v12 = vpop.eup %5822 }
0x18a6   :  { %v2959_v13 = vsel %vm431_vm4, %v5823_v12, 0.0 }
0x18a7   :  { %2960 = vadd.xlane.f32.xlu1 %v2959_v13 }
0x1909   :  { %v3120_v14 = vpop.xlane.xlu0 %3119 }
0x190a   :  { %v3121_v40 = vsub.f32 %v3117_v50, %v3120_v14  ;;  %v6481_v50 = vld [vmem:[%s6644_s5 + $0x30] sm:$0xff] }
0x190c   :  { %v3122_v15 = vmul.f32 1.442695, %v3121_v40 }
0x190d   :  { %v3357_v36 = vpop.permute.xlu0 %3356 }
0x190e   :  { %5824 = vpow2.f32 %v3122_v15 }
0x1918   :  { %v5825_v41 = vpop.eup %5824 }
0x1919   :  { %v3124_v28 = vsel %vm431_vm4, %v5825_v41, 0.0 }
0x191a   :  { %3125 = vadd.xlane.f32.xlu1 %v3124_v28 }
0x192b   :  { %3130 = vrot.lane.b32.xlu1 %v6410_v35, %s5963_s27 }
0x192f   :  { %3354 = vrot.lane.b32.xlu1 %v6390_v58, %s5964_s29 }
0x1934   :  { %v2961_v17 = vpop.xlane.xlu1 %2960 }
0x1935   :  { %5826 = vrcp.f32 %v2961_v17 }
0x193f   :  { %v5827_v18 = vpop.eup %5826 }
0x1940   :  { %v2963_v11 = vmul.f32 %v5827_v18, %v5823_v12 }
0x1942   :  { %5557 = vmatmul.mubr.msk.f32.vlgmr.msra.gmra.mrb[36].mxu0 %vm431_vm4, %v2963_v11 }
0x1943   :  { %5566 = vmatprep.mubr.msk.f32.mxu0 %vm5962_vm3, %v5961_v30 }
0x19a7   :  { %v3126_v20 = vpop.xlane.xlu1 %3125 }
0x19a8   :  { %5828 = vrcp.f32 %v3126_v20 }
0x19ab   :  { %v3131_v3 = vpop.permute.xlu1 %3130 }
0x19ac   :  { %5565 = vmatpush3.msra.mxu0 %v3131_v3 }
0x19ad   :  { %5574 = vmatprep.subr.mxu0 %v5961_v30 }
0x19af   :  { %v3355_v38 = vpop.permute.xlu1 %3354 }
0x19b2   :  { %v5829_v21 = vpop.eup %5828 }
0x19b3   :  { %v3128_v22 = vmul.f32 %v5829_v21, %v5825_v41 }
0x19b5   :  { %5567 = vmatmul.mubr.msk.f32.vlgmr.msra.gmra.mrb[38].mxu0 %vm431_vm4, %v3128_v22 }
0x19b6   :  { %5575 = vmatpush3.msra.mxu0 %v6443_v24  ;;  %5576 = vmatprep.mubr.msk.f32.mxu0 %vm5962_vm3, %v5961_v30 }
0x19b7   :  { %5584 = vmatprep.subr.mxu0 %v5961_v30 }
0x1a15   :  { %v3033_v25 = vpop.f32.mrb[36].mxu0 }
0x1a16   :  { %v5558_v26 = vpop.f32.mrb[37].mxu0  ;;  %5577 = vmatmul.mubr.msk.f32.vlgmr.msra.gmra.mrb[40].mxu0 %vm431_vm4, %v3033_v25 }
0x1a17   :  { %5586 = vmatprep.mubr.msk.f32.mxu0 %vm5962_vm3, %v5961_v30 }
0x1a88   :  { %v3202_v29 = vpop.f32.mrb[38].mxu0 }
0x1a89   :  { %v5568_v37 = vpop.f32.mrb[39].mxu0  ;;  %5572 = vmatmul.mubr.msk.f32.vlgmr.msra.gmra.mrb[34].mxu1 %vm431_vm4, %v3202_v29 }
0x1a8a   :  { %5580 = vmatpush3.xpose.msk.msra.mxu1 %vm431_vm4, %v3357_v36  ;;  %5581 = vmatprep.mubr.msk.f32.mxu1 %vm5962_vm3, %v5961_v30 }
0x1a8b   :  { %5589 = vmatprep.subr.mxu1 %v5961_v30 }
0x1a8d   :  { %5582 = vmatmul.mubr.msk.f32.vlgmr.msra.gmra.mrb[36].mxu1 %vm431_vm4, %v3355_v38 }
0x1a8e   :  { %5591 = vmatprep.mubr.msk.f32.mxu1 %vm5962_vm3, %v5961_v30  ;;  %5590 = vmatpush3.msra.mxu1 %v6481_v50 }
0x1a8f   :  { %5599 = vmatprep.subr.mxu1 %v5961_v30 }
0x1ae9   :  { %v3350_v39 = vpop.f32.mrb[40].mxu0 }
0x1aea   :  { %v5578_v45 = vpop.f32.mrb[41].mxu0 }
0x1b5c   :  { %v3277_v51 = vpop.f32.mrb[34].mxu1 }
0x1b5d   :  { %v3351_v52 = vadd.f32 %v3350_v39, %v3277_v51  ;;  %v5573_v43 = vpop.f32.mrb[35].mxu1 }
0x1b60   :  { %v3428_v53 = vpop.f32.mrb[36].mxu1 }
0x1b61   :  { %v3432_v46 = vmul.f32 0.35355338, %v3428_v53  ;;  %v5583_v57 = vpop.f32.mrb[37].mxu1 }
0x1b63   :  { %v3433_v16 = vsel %vm431_vm4, %v3432_v46, -inf }
0x1b64   :  { %3434 = vmax.xlane.f32.xlu1 %v3433_v16 }
0x1b75   :  { %3598 = vrot.lane.b32.xlu1 %v6392_v59, %s5965_s4 }
0x1b79   :  { %3596 = vrot.lane.b32.xlu1 %v6390_v58, %s5965_s4 }
0x1bf1   :  { %v3435_v60 = vpop.xlane.xlu1 %3434 }
0x1bf2   :  { %v3436_v63 = vsub.f32 %v3432_v46, %v3435_v60 }
0x1bf4   :  { %v3437_v0 = vmul.f32 1.442695, %v3436_v63 }
0x1bf5   :  { %v3599_v4 = vpop.permute.xlu1 %3598 }
0x1bf6   :  { %5830 = vpow2.f32 %v3437_v0 }
0x1bf9   :  { %v3597_v5 = vpop.permute.xlu1 %3596 }
0x1c00   :  { %v5831_v44 = vpop.eup %5830 }
0x1c01   :  { %v3439_v1 = vsel %vm431_vm4, %v5831_v44, 0.0 }
0x1c02   :  { %3440 = vadd.xlane.f32.xlu0 %v3439_v1 }
0x1c18   :  { %3444 = vrot.lane.b32.xlu0 %v6410_v35, %s5964_s29 }
0x1c8f   :  { %v3441_v61 = vpop.xlane.xlu0 %3440 }
0x1c90   :  { %5832 = vrcp.f32 %v3441_v61 }
0x1c93   :  { %v3445_v2 = vpop.permute.xlu0 %3444 }
0x1c94   :  { %5585 = vmatpush3.msra.mxu0 %v3445_v2 }
0x1c95   :  { %5594 = vmatprep.subr.mxu0 %v5961_v30 }
0x1c9a   :  { %v5833_v59 = vpop.eup %5832 }
0x1c9b   :  { %v3443_v58 = vmul.f32 %v5833_v59, %v5831_v44 }
0x1c9d   :  { %5587 = vmatmul.mubr.msk.f32.vlgmr.msra.gmra.mrb[42].mxu0 %vm431_vm4, %v3443_v58 }
0x1c9e   :  { %5595 = vmatpush3.xpose.msk.msra.mxu0 %vm431_vm4, %v3599_v4  ;;  %5596 = vmatprep.mubr.msk.f32.mxu0 %vm5962_vm3, %v5961_v30 }
0x1c9f   :  { %5604 = vmatprep.subr.mxu0 %v5961_v30 }
0x1ca1   :  { %5597 = vmatmul.mubr.msk.f32.vlgmr.msra.gmra.mrb[44].mxu0 %vm431_vm4, %v3597_v5 }
0x1ca2   :  { %5606 = vmatprep.mubr.msk.f32.mxu0 %vm5962_vm3, %v5961_v30 }
0x1d70   :  { %v3516_v6 = vpop.f32.mrb[42].mxu0 }
0x1d71   :  { %v5588_v7 = vpop.f32.mrb[43].mxu0  ;;  %5592 = vmatmul.mubr.msk.f32.vlgmr.msra.gmra.mrb[38].mxu1 %vm431_vm4, %v3516_v6 }
0x1d72   :  { %5601 = vmatprep.mubr.msk.f32.mxu1 %vm5962_vm3, %v5961_v30 }
0x1d74   :  { %v3670_v8 = vpop.f32.mrb[44].mxu0 }
0x1d75   :  { %v3674_v9 = vmul.f32 0.35355338, %v3670_v8  ;;  %v5598_v10 = vpop.f32.mrb[45].mxu0 }
0x1d77   :  { %v3675_v12 = vsel %vm431_vm4, %v3674_v9, -inf }
0x1d78   :  { %3676 = vmax.xlane.f32.xlu0 %v3675_v12 }
0x1d8e   :  { %3686 = vrot.lane.b32.xlu0 %v6410_v35, %s5965_s4  ;;  %v6500_v35 = vld [vmem:[%s6644_s5 + $0x38] sm:$0xff] }
0x1d8f   :  { %5605 = vmatpush3.msra.mxu0 %v6500_v35 }
0x1d90   :  { %5614 = vmatprep.subr.mxu0 %v5961_v30 }
0x1d92   :  { %3999 = vrot.lane.b32.xlu0 %v6386_v27, %s5963_s27 }
0x1e05   :  { %v3677_v13 = vpop.xlane.xlu0 %3676 }
0x1e06   :  { %v3678_v14 = vsub.f32 %v3674_v9, %v3677_v13 }
0x1e08   :  { %v3679_v40 = vmul.f32 1.442695, %v3678_v14 }
0x1e09   :  { %v3687_v15 = vpop.permute.xlu0 %3686 }
0x1e0a   :  { %5834 = vpow2.f32 %v3679_v40  ;;  %5600 = vmatpush3.msra.mxu1 %v3687_v15 }
0x1e0b   :  { %5609 = vmatprep.subr.mxu1 %v5961_v30 }
0x1e0d   :  { %v4000_v25 = vpop.permute.xlu0 %3999 }
0x1e14   :  { %v5835_v41 = vpop.eup %5834 }
0x1e15   :  { %v3681_v28 = vsel %vm431_vm4, %v5835_v41, 0.0 }
0x1e16   :  { %3682 = vadd.xlane.f32.xlu1 %v3681_v28 }
0x1e27   :  { %4001 = vrot.lane.b32.xlu1 %v6388_v54, %s5963_s27 }
0x1e44   :  { %v3591_v17 = vpop.f32.mrb[38].mxu1 }
0x1e45   :  { %v3595_v18 = vadd.f32 %v3591_v17, %v3351_v52  ;;  %v5593_v11 = vpop.f32.mrb[39].mxu1 }
0x1ea3   :  { %v3683_v20 = vpop.xlane.xlu1 %3682 }
0x1ea4   :  { %5836 = vrcp.f32 %v3683_v20 }
0x1ea7   :  { %v4002_v22 = vpop.permute.xlu1 %4001 }
0x1eae   :  { %v5837_v3 = vpop.eup %5836 }
0x1eaf   :  { %v3685_v21 = vmul.f32 %v5837_v3, %v5835_v41 }
0x1eb1   :  { %5602 = vmatmul.mubr.msk.f32.vlgmr.msra.gmra.mrb[40].mxu1 %vm431_vm4, %v3685_v21 }
0x1eb2   :  { %5610 = vmatpush3.xpose.msk.msra.mxu1 %vm431_vm4, %v6388_v54  ;;  %5611 = vmatprep.mubr.msk.f32.mxu1 %vm5962_vm3, %v5961_v30 }
0x1eb3   :  { %5619 = vmatprep.subr.mxu1 %v5961_v30 }
0x1eb5   :  { %5612 = vmatmul.mubr.msk.f32.vlgmr.msra.gmra.mrb[42].mxu1 %vm431_vm4, %v6386_v27 }
0x1eb6   :  { %5620 = vmatpush3.xpose.msk.msra.mxu1 %vm431_vm4, %v4002_v22  ;;  %5621 = vmatprep.mubr.msk.f32.mxu1 %vm5962_vm3, %v5961_v30 }
0x1eb7   :  { %5629 = vmatprep.subr.mxu1 %v5961_v30 }
0x1eb9   :  { %5622 = vmatmul.mubr.msk.f32.vlgmr.msra.gmra.mrb[44].mxu1 %vm431_vm4, %v4000_v25 }
0x1eba   :  { %5630 = vmatpush3.msra.mxu1 %v6435_v19  ;;  %5631 = vmatprep.mubr.msk.f32.mxu1 %vm5962_vm3, %v5961_v30 }
0x1ebb   :  { %5639 = vmatprep.subr.mxu1 %v5961_v30 }
0x1f84   :  { %v3758_v26 = vpop.f32.mrb[40].mxu1 }
0x1f85   :  { %v5603_v29 = vpop.f32.mrb[41].mxu1  ;;  %5607 = vmatmul.mubr.msk.f32.vlgmr.msra.gmra.mrb[46].mxu0 %vm431_vm4, %v3758_v26 }
0x1f86   :  { %5615 = vmatpush3.msra.mxu0 %v6408_v62  ;;  %5616 = vmatprep.mubr.msk.f32.mxu0 %vm5962_vm3, %v5961_v30 }
0x1f87   :  { %5624 = vmatprep.subr.mxu0 %v5961_v30 }
0x1f88   :  { %v3910_v36 = vpop.f32.mrb[42].mxu1 }
0x1f89   :  { %v3914_v37 = vmul.f32 0.35355338, %v3910_v36  ;;  %v5613_v38 = vpop.f32.mrb[43].mxu1 }
0x1f8b   :  { %v3915_v19 = vsel %vm431_vm4, %v3914_v37, -inf }
0x1f8c   :  { %3916 = vmax.xlane.f32.xlu1 %v3915_v19  ;;  %v4073_v39 = vpop.f32.mrb[44].mxu1 }
0x1f8d   :  { %v4077_v45 = vmul.f32 0.35355338, %v4073_v39  ;;  %v5623_v51 = vpop.f32.mrb[45].mxu1 }
0x1f8f   :  { %v4078_v52 = vsel %vm431_vm4, %v4077_v45, -inf }
0x1f90   :  { %4079 = vmax.xlane.f32.xlu0 %v4078_v52 }
0x2019   :  { %v3917_v43 = vpop.xlane.xlu1 %3916 }
0x201a   :  { %v3918_v53 = vsub.f32 %v3914_v37, %v3917_v43 }
0x201c   :  { %v3919_v46 = vmul.f32 1.442695, %v3918_v53 }
0x201d   :  { %v4080_v57 = vpop.xlane.xlu0 %4079 }
0x201e   :  { %5838 = vpow2.f32 %v3919_v46  ;;  %v4081_v16 = vsub.f32 %v4077_v45, %v4080_v57 }
0x2020   :  { %v4082_v60 = vmul.f32 1.442695, %v4081_v16 }
0x2022   :  { %5840 = vpow2.f32 %v4082_v60 }
0x2028   :  { %v5839_v63 = vpop.eup %5838 }
0x2029   :  { %v3921_v0 = vsel %vm431_vm4, %v5839_v63, 0.0 }
0x202a   :  { %3922 = vadd.xlane.f32.xlu0 %v3921_v0 }
0x202c   :  { %v5841_v44 = vpop.eup %5840 }
0x202d   :  { %v4084_v1 = vsel %vm431_vm4, %v5841_v44, 0.0 }
0x202e   :  { %4085 = vadd.xlane.f32.xlu1 %v4084_v1 }
0x203f   :  { %4314 = vrot.lane.b32.xlu1 %v6388_v54, %s5964_s29 }
0x2040   :  { %4090 = vrot.lane.b32.xlu0 %v6408_v62, %s5963_s27 }
0x2043   :  { %4312 = vrot.lane.b32.xlu1 %v6386_v27, %s5964_s29 }
0x2058   :  { %v3833_v61 = vpop.f32.mrb[46].mxu0 }
0x2059   :  { %v6536_v2 = vadd.f32 %v3833_v61, %v3595_v18  ;;  %v5608_v59 = vpop.f32.mrb[47].mxu0 }
0x20b7   :  { %v3923_v4 = vpop.xlane.xlu0 %3922 }
0x20b8   :  { %5842 = vrcp.f32 %v3923_v4 }
0x20bb   :  { %v4086_v58 = vpop.xlane.xlu1 %4085  ;;  %v4091_v7 = vpop.permute.xlu0 %4090 }
0x20bc   :  { %5844 = vrcp.f32 %v4086_v58 }
0x20bf   :  { %v4315_v13 = vpop.permute.xlu1 %4314 }
0x20c2   :  { %v5843_v5 = vpop.eup %5842 }
0x20c3   :  { %v3925_v6 = vmul.f32 %v5843_v5, %v5839_v63 }
0x20c5   :  { %5617 = vmatmul.mubr.msk.f32.vlgmr.msra.gmra.mrb[48].mxu0 %vm431_vm4, %v3925_v6 }
0x20c6   :  { %v5845_v8 = vpop.eup %5844  ;;  %5625 = vmatpush3.msra.mxu0 %v4091_v7  ;;  %5626 = vmatprep.mubr.msk.f32.mxu0 %vm5962_vm3, %v5961_v30 }
0x20c7   :  { %v4088_v9 = vmul.f32 %v5845_v8, %v5841_v44  ;;  %5634 = vmatprep.subr.mxu0 %v5961_v30 }
0x20c9   :  { %5627 = vmatmul.mubr.msk.f32.vlgmr.msra.gmra.mrb[50].mxu0 %vm431_vm4, %v4088_v9 }
0x20ca   :  { %5635 = vmatpush3.msra.mxu0 %v6443_v24  ;;  %5636 = vmatprep.mubr.msk.f32.mxu0 %vm5962_vm3, %v5961_v30  ;;  %v4313_v24 = vpop.permute.xlu1 %4312 }
0x20cb   :  { %5644 = vmatprep.subr.mxu0 %v5961_v30 }
0x2198   :  { %v3995_v10 = vpop.f32.mrb[48].mxu0 }
0x2199   :  { %v5618_v12 = vpop.f32.mrb[49].mxu0  ;;  %5637 = vmatmul.mubr.msk.f32.vlgmr.msra.gmra.mrb[52].mxu0 %vm431_vm4, %v3995_v10 }
0x219a   :  { %5646 = vmatprep.mubr.msk.f32.mxu0 %vm5962_vm3, %v5961_v30 }
0x219c   :  { %v4162_v14 = vpop.f32.mrb[50].mxu0 }
0x219d   :  { %v5628_v40 = vpop.f32.mrb[51].mxu0  ;;  %5632 = vmatmul.mubr.msk.f32.vlgmr.msra.gmra.mrb[46].mxu1 %vm431_vm4, %v4162_v14 }
0x219e   :  { %5640 = vmatpush3.xpose.msk.msra.mxu1 %vm431_vm4, %v4315_v13  ;;  %5641 = vmatprep.mubr.msk.f32.mxu1 %vm5962_vm3, %v5961_v30 }
0x219f   :  { %5649 = vmatprep.subr.mxu1 %v5961_v30 }
0x21a1   :  { %5642 = vmatmul.mubr.msk.f32.vlgmr.msra.gmra.mrb[48].mxu1 %vm431_vm4, %v4313_v24 }
0x21a2   :  { %5650 = vmatpush3.msra.mxu1 %v6481_v50  ;;  %5651 = vmatprep.mubr.msk.f32.mxu1 %vm5962_vm3, %v5961_v30 }
0x21a3   :  { %5659 = vmatprep.subr.mxu1 %v5961_v30 }
0x226c   :  { %v4308_v15 = vpop.f32.mrb[52].mxu0 }
0x226d   :  { %v5638_v41 = vpop.f32.mrb[53].mxu0 }
0x2270   :  { %v4235_v28 = vpop.f32.mrb[46].mxu1 }
0x2271   :  { %v4309_v17 = vadd.f32 %v4308_v15, %v4235_v28  ;;  %v5633_v18 = vpop.f32.mrb[47].mxu1 }
0x2274   :  { %v4386_v11 = vpop.f32.mrb[48].mxu1 }
0x2275   :  { %v4390_v20 = vmul.f32 0.35355338, %v4386_v11  ;;  %v5643_v3 = vpop.f32.mrb[49].mxu1 }
0x2277   :  { %v4391_v21 = vsel %vm431_vm4, %v4390_v20, -inf }
0x2278   :  { %4392 = vmax.xlane.f32.xlu0 %v4391_v21 }
0x228e   :  { %4402 = vrot.lane.b32.xlu0 %v6408_v62, %s5964_s29 }
0x2292   :  { %4552 = vrot.lane.b32.xlu0 %v6386_v27, %s5965_s4 }
0x2305   :  { %v4393_v50 = vpop.xlane.xlu0 %4392 }
0x2306   :  { %v4394_v22 = vsub.f32 %v4390_v20, %v4393_v50 }
0x2308   :  { %v4395_v25 = vmul.f32 1.442695, %v4394_v22  ;;  %v4835_v22 = vrot.slane %v6380_v48, %v2390_v56 }
0x2309   :  { %v4403_v26 = vpop.permute.xlu0 %4402 }
0x230a   :  { %5846 = vpow2.f32 %v4395_v25  ;;  %5645 = vmatpush3.msra.mxu0 %v4403_v26 }
0x230b   :  { %5654 = vmatprep.subr.mxu0 %v5961_v30 }
0x230d   :  { %v4553_v39 = vpop.permute.xlu0 %4552 }
0x2314   :  { %v5847_v29 = vpop.eup %5846 }
0x2315   :  { %v4397_v36 = vsel %vm431_vm4, %v5847_v29, 0.0 }
0x2316   :  { %4398 = vadd.xlane.f32.xlu1 %v4397_v36  ;;  %v4840_v36 = vld [vmem:[#allocation7 + $0x48] sm:$0xff] }
0x2327   :  { %4554 = vrot.lane.b32.xlu1 %v6388_v54, %s5965_s4  ;;  %v4795_v54 = vrot.slane %v6380_v48, %v2349_v23 }
0x2329   :  { %v4796_v52 = vadd.f32 %v4795_v54, %v6536_v2 }
0x232b   :  { %v4798_v57 = vadd.f32 %v4796_v52, %v6356_v49 }
0x232d   :  { %v4800_v16 = vsel %vm181_vm2, %v4798_v57, 0.0 }
0x23a3   :  { %v4399_v37 = vpop.xlane.xlu1 %4398 }
0x23a4   :  { %5848 = vrcp.f32 %v4399_v37 }
0x23a7   :  { %v4555_v27 = vpop.permute.xlu1 %4554 }
0x23ae   :  { %v5849_v38 = vpop.eup %5848 }
0x23af   :  { %v4401_v19 = vmul.f32 %v5849_v38, %v5847_v29  ;;  %v4839_v29 = vld [vmem:[#allocation7 + $0x40] sm:$0xff]  ;;  %v4841_v38 = vld [vmem:[#allocation7 + $0x50] sm:$0xff] }
0x23b0   :  { %v5755_v37 = vpack.c.bf16 %v4840_v36, %v4839_v29 }
0x23b1   :  { %5647 = vmatmul.mubr.msk.f32.vlgmr.msra.gmra.mrb[54].mxu0 %vm431_vm4, %v4401_v19  ;;  %v4842_v19 = vld [vmem:[#allocation7 + $0x58] sm:$0xff] }
0x23b2   :  { %5655 = vmatpush3.xpose.msk.msra.mxu0 %vm431_vm4, %v4555_v27  ;;  %5656 = vmatprep.mubr.msk.f32.mxu0 %vm5962_vm3, %v5961_v30  ;;  %v5759_v27 = vpack.c.bf16 %v4842_v19, %v4841_v38 }
0x23b3   :  { %5664 = vmatprep.subr.mxu0 %v5961_v30 }
0x23b5   :  { %5657 = vmatmul.mubr.msk.f32.vlgmr.msra.gmra.mrb[56].mxu0 %vm431_vm4, %v4553_v39  ;;  %v4932_v39 = vld [vmem:[#allocation7 + $0x68] sm:$0xff] }
0x23b6   :  { %5665 = vmatpush3.msra.mxu0 %v6500_v35  ;;  %5666 = vmatprep.mubr.msk.f32.mxu0 %vm5962_vm3, %v5961_v30 }
0x2484   :  { %v4474_v45 = vpop.f32.mrb[54].mxu0 }
0x2485   :  { %v5648_v51 = vpop.f32.mrb[55].mxu0  ;;  %5652 = vmatmul.mubr.msk.f32.vlgmr.msra.gmra.mrb[50].mxu1 %vm431_vm4, %v4474_v45 }
0x2486   :  { %5661 = vmatprep.mubr.msk.f32.mxu1 %vm5962_vm3, %v5961_v30 }
0x2488   :  { %v4626_v43 = vpop.f32.mrb[56].mxu0 }
0x2489   :  { %v4630_v53 = vmul.f32 0.35355338, %v4626_v43  ;;  %v5658_v46 = vpop.f32.mrb[57].mxu0 }
0x248b   :  { %v4631_v35 = vsel %vm431_vm4, %v4630_v53, -inf }
0x248c   :  { %4632 = vmax.xlane.f32.xlu1 %v4631_v35  ;;  %v4933_v35 = vld [vmem:[#allocation7 + $0x70] sm:$0xff] }
0x2490   :  { %4801 = vadd.xlane.f32.xlu1 %v4800_v16 }
0x2519   :  { %v4633_v23 = vpop.xlane.xlu1 %4632 }
0x251a   :  { %v4634_v60 = vsub.f32 %v4630_v53, %v4633_v23  ;;  %v4846_v23 = vrot.slane %v6380_v48, %v2400_v31 }
0x251c   :  { %v4635_v63 = vmul.f32 1.442695, %v4634_v60 }
0x251d   :  { %v4802_v6 = vpop.xlane.xlu1 %4801 }
0x251e   :  { %5850 = vpow2.f32 %v4635_v63  ;;  %v4806_v7 = vmul.f32 0.03125, %v4802_v6 }
0x2520   :  { %v4808_v10 = vsub.f32 %v4798_v57, %v4806_v7  ;;  %v4934_v57 = vld [vmem:[#allocation7 + $0x78] sm:$0xff] }
0x2521   :  { %v5767_v16 = vpack.c.bf16 %v4934_v57, %v4933_v35 }
0x2522   :  { %v4810_v40 = vmul.f32 %v4808_v10, %v4808_v10 }
0x2524   :  { %v4812_v24 = vsel %vm181_vm2, %v4810_v40, 0.0 }
0x2528   :  { %v5851_v0 = vpop.eup %5850 }
0x2529   :  { %v4637_v30 = vsel %vm431_vm4, %v5851_v0, 0.0 }
0x252a   :  { %4638 = vadd.xlane.f32.xlu0 %v4637_v30 }
0x2540   :  { %4642 = vrot.lane.b32.xlu0 %v6408_v62, %s5965_s4 }
0x2558   :  { %v4547_v44 = vpop.f32.mrb[50].mxu1 }
0x2559   :  { %v4551_v1 = vadd.f32 %v4547_v44, %v4309_v17  ;;  %v5653_v61 = vpop.f32.mrb[51].mxu1 }
0x255a   :  { %v4938_v61 = vrot.slane %v6380_v48, %v2492_v47 }
0x25b7   :  { %v4639_v2 = vpop.xlane.xlu0 %4638 }
0x25b8   :  { %5852 = vrcp.f32 %v4639_v2 }
0x25bb   :  { %v4643_v49 = vpop.permute.xlu0 %4642 }
0x25bc   :  { %5660 = vmatpush3.msra.mxu1 %v4643_v49 }
0x25bd   :  { %5756 = vmatprep.subr.bf16.mxu1 %v5755_v37 }
0x25c2   :  { %v5853_v59 = vpop.eup %5852 }
0x25c3   :  { %v4641_v4 = vmul.f32 %v5853_v59, %v5851_v0 }
0x25c5   :  { %5662 = vmatmul.mubr.msk.f32.vlgmr.msra.gmra.mrb[52].mxu1 %vm431_vm4, %v4641_v4 }
0x25c6   :  { %5758 = vmatpush3.bf16.msra.mxu1 %v5755_v37 }
0x25c7   :  { %5760 = vmatprep.subr.bf16.mxu1 %v5759_v27 }
0x25ca   :  { %5762 = vmatpush3.bf16.msra.mxu1 %v5759_v27 }
0x2698   :  { %v4714_v58 = vpop.f32.mrb[52].mxu1 }
0x2699   :  { %v5663_v5 = vpop.f32.mrb[53].mxu1  ;;  %5667 = vmatmul.mubr.msk.f32.vlgmr.msra.gmra.mrb[58].mxu0 %vm431_vm4, %v4714_v58 }
0x276c   :  { %v4787_v8 = vpop.f32.mrb[58].mxu0 }
0x276d   :  { %v4791_v9 = vadd.f32 %v4787_v8, %v4551_v1  ;;  %v5668_v62 = vpop.f32.mrb[59].mxu0 }
0x276f   :  { %v4797_v12 = vadd.f32 %v4795_v54, %v4791_v9 }
0x2771   :  { %v4799_v13 = vadd.f32 %v4797_v12, %v6362_v42  ;;  %v4829_v42 = vrot.slane %v6380_v48, %v2384_v55  ;;  %v4931_v55 = vld [vmem:[#allocation7 + $0x60] sm:$0xff] }
0x2772   :  { %v5763_v54 = vpack.c.bf16 %v4932_v39, %v4931_v55 }
0x2773   :  { %v4803_v14 = vsel %vm181_vm2, %v4799_v13, 0.0 }
0x2774   :  { %4804 = vadd.xlane.f32.xlu1 %v4803_v14  ;;  %5764 = vmatprep.subr.bf16.mxu0 %v5763_v54 }
0x2775   :  { %5766 = vmatpush3.bf16.msra.mxu0 %v5763_v54 }
0x2776   :  { %5768 = vmatprep.subr.bf16.mxu0 %v5767_v16 }
0x2778   :  { %4813 = vadd.xlane.f32.xlu1 %v4812_v24 }
0x2779   :  { %5770 = vmatpush3.bf16.msra.mxu0 %v5767_v16 }
0x2801   :  { %v4805_v15 = vpop.xlane.xlu1 %4804 }
0x2802   :  { %v4807_v41 = vmul.f32 0.03125, %v4805_v15 }
0x2804   :  { %v4809_v28 = vsub.f32 %v4799_v13, %v4807_v41 }
0x2805   :  { %v4814_v17 = vpop.xlane.xlu1 %4813 }
0x2806   :  { %v4818_v18 = vmul.f32 0.03125, %v4814_v17  ;;  %v4811_v11 = vmul.f32 %v4809_v28, %v4809_v28  ;;  %v5130_v17 = vld [vmem:[%s6646_s7 + $0x18] sm:$0x3]  ;;  %s5928_s7 = scalar_lea.vmem %s5068_s6, 256 }
0x2807   :  { %p5929_p10 = scmp.ne.s32.totalorder %s5068_s6, %s5928_s7  ;;  %p5934_p12 = scmp.lt.s32.totalorder %s5928_s7, %s5928_s7 }
0x2808   :  { %v4820_v20 = vadd.f32 1e-05, %v4818_v18  ;;  %v4815_v3 = vsel %vm181_vm2, %v4811_v11, 0.0  ;;  %v5051_v18 = vrot.slane %v5130_v17, %v6101_v33 }
0x2809   :  { %4816 = vadd.xlane.f32.xlu1 %v4815_v3  ;;  %v5057_v3 = vrot.slane %v5130_v17, %v6104_v34  ;;  %p5935_p13 = por %p5934_p12, %p5933_p11 }
0x280a   :  { %5854 = vrsqrt.f32 %v4820_v20 }
0x280b   :  { %p5936_p0 = pnand %p5935_p13, %p5929_p10 }
0x2814   :  { %v5855_v21 = vpop.eup %5854 }
0x2815   :  { %v4824_v50 = vmul.f32 %v5855_v21, %v4808_v10 }
0x2817   :  { %v4830_v25 = vmul.f32 %v4829_v42, %v4824_v50 }
0x2819   :  { %v4836_v26 = vadd.f32 %v4835_v22, %v4830_v25 }
0x281b   :  { %5677 = vmatprep.mubr.msk.f32.mxu1 %vm181_vm2, %v4836_v26 }
0x2896   :  { %v4817_v56 = vpop.xlane.xlu1 %4816 }
0x2897   :  { %v4819_v45 = vmul.f32 0.03125, %v4817_v56 }
0x2899   :  { %v4821_v51 = vadd.f32 1e-05, %v4819_v45 }
0x289b   :  { %5856 = vrsqrt.f32 %v4821_v51 }
0x28a5   :  { %v5857_v52 = vpop.eup %5856 }
0x28a6   :  { %v4825_v43 = vmul.f32 %v5857_v52, %v4809_v28 }
0x28a8   :  { %v4831_v53 = vmul.f32 %v4829_v42, %v4825_v43 }
0x28aa   :  { %v4837_v46 = vadd.f32 %v4835_v22, %v4831_v53 }
0x28ac   :  { %5678 = vmatmul.mubr.msk.f32.vlgmr.msra.gmra.mrb[54].mxu1 %vm181_vm2, %v4837_v46 }
0x297f   :  { %v5679_v60 = vpop.f32.mrb[54].mxu1 }
0x2980   :  { %v4925_v63 = vadd.f32 %v5679_v60, %v4846_v23  ;;  %v4919_v0 = vpop.f32.mrb[55].mxu1 }
0x2981   :  { %v4920_v30 = vadd.f32 %v4919_v0, %v4846_v23 }
0x2982   :  { %v4929_v1 = vmax.f32 %v4925_v63, 0.0 }
0x2983   :  { %v4928_v44 = vmax.f32 %v4920_v30, 0.0 }
0x2985   :  { %5688 = vmatprep.mubr.msk.f32.mxu0 %vm181_vm2, %v4928_v44 }
0x2986   :  { %5689 = vmatmul.mubr.msk.f32.vlgmr.msra.gmra.mrb[60].mxu0 %vm181_vm2, %v4929_v1 }
0x2a59   :  { %v5690_v2 = vpop.f32.mrb[60].mxu0 }
0x2a5a   :  { %v5011_v49 = vpop.f32.mrb[61].mxu0  ;;  %v5017_v59 = vadd.f32 %v5690_v2, %v4938_v61 }
0x2a5b   :  { %v5012_v4 = vadd.f32 %v5011_v49, %v4938_v61 }
0x2a5c   :  { %v5021_v5 = vadd.f32 %v5017_v59, %v4837_v46 }
0x2a5d   :  { %v5020_v58 = vadd.f32 %v5012_v4, %v4836_v26 }
0x2a5e   :  { %v5025_v6 = vsel %vm181_vm2, %v5021_v5, 0.0 }
0x2a5f   :  { %v5022_v31 = vsel %vm181_vm2, %v5020_v58, 0.0 }
0x2a60   :  { %5023 = vadd.xlane.f32.xlu1 %v5022_v31 }
0x2a64   :  { %5026 = vadd.xlane.f32.xlu1 %v5025_v6 }
0x2aed   :  { %v5024_v7 = vpop.xlane.xlu1 %5023 }
0x2aee   :  { %v5028_v8 = vmul.f32 0.03125, %v5024_v7 }
0x2af0   :  { %v5030_v9 = vsub.f32 %v5020_v58, %v5028_v8 }
0x2af1   :  { %v5027_v62 = vpop.xlane.xlu1 %5026 }
0x2af2   :  { %v5029_v10 = vmul.f32 0.03125, %v5027_v62  ;;  %v5032_v32 = vmul.f32 %v5030_v9, %v5030_v9 }
0x2af4   :  { %v5031_v12 = vsub.f32 %v5021_v5, %v5029_v10  ;;  %v5034_v47 = vsel %vm181_vm2, %v5032_v32, 0.0 }
0x2af5   :  { %5035 = vadd.xlane.f32.xlu0 %v5034_v47 }
0x2af6   :  { %v5033_v48 = vmul.f32 %v5031_v12, %v5031_v12 }
0x2af8   :  { %v5037_v13 = vsel %vm181_vm2, %v5033_v48, 0.0 }
0x2af9   :  { %5038 = vadd.xlane.f32.xlu1 %v5037_v13 }
0x2b82   :  { %v5036_v14 = vpop.xlane.xlu0 %5035 }
0x2b83   :  { %v5040_v40 = vmul.f32 0.03125, %v5036_v14 }
0x2b85   :  { %v5042_v24 = vadd.f32 1e-05, %v5040_v40 }
0x2b86   :  { %v5039_v15 = vpop.xlane.xlu1 %5038 }
0x2b87   :  { %5858 = vrsqrt.f32 %v5042_v24  ;;  %v5041_v41 = vmul.f32 0.03125, %v5039_v15 }
0x2b89   :  { %v5043_v28 = vadd.f32 1e-05, %v5041_v41 }
0x2b8b   :  { %5860 = vrsqrt.f32 %v5043_v28 }
0x2b91   :  { %v5859_v11 = vpop.eup %5858 }
0x2b92   :  { %v5046_v20 = vmul.f32 %v5859_v11, %v5030_v9 }
0x2b94   :  { %v5052_v42 = vmul.f32 %v5051_v18, %v5046_v20 }
0x2b95   :  { %v5861_v21 = vpop.eup %5860 }
0x2b96   :  { %v5047_v50 = vmul.f32 %v5861_v21, %v5031_v12  ;;  %v5058_v22 = vadd.f32 %v5057_v3, %v5052_v42 }
0x2b98   :  { %v5053_v25 = vmul.f32 %v5051_v18, %v5047_v50  ;;  %5060 = vst.msk [vmem:[#allocation8] sm:$0xff] %vm181_vm2, %v5058_v22 }
0x2b9a   :  { %v5059_v26 = vadd.f32 %v5057_v3, %v5053_v25 }
0x2b9c   :  { %5061 = vst.msk [vmem:[#allocation8 + $0x8] sm:$0xff] %vm181_vm2, %v5059_v26 }
0x2b9d   :  { %5939 = shalt.err (!%p5936_p0)
}
0x2b9e   :  { %s5940_s4 = scalar_lea.hbm %s6647_s8, 256 }
0x2b9f   :  { %p5941_p1 = scmp.ne.s32.totalorder %s6647_s8, %s5940_s4  ;;  %p5944_p2 = scmp.lt.u32.totalorder %s5940_s4, %s6647_s8 }
0x2ba1   :  { %p5946_p3 = pnand %p5944_p2, %p5941_p1 }
0x2ba3   :  { %5949 = shalt.err (!%p5946_p3)
}
0x2ba4   :  { %5073 = dma.vmem_to_hbm [thread:$0]  %s5068_s6, 256, %s6647_s8, [#allocation4], %s5958_s17, %s5958_s17, %s5959_s18  }
0x2ba5   :  { %5954 = dma.done.wait [#allocation4], 256  }
0x2ba6   :  { %5955 = vsyncadd [#allocation4], 4294967040 }
0x2ba7   :  { %5077 = vsyncpa [#allocation3], 1 }
0x2ba8   :  { %5078 = vsyncpa [#allocation6], 1 }
0x2ba9   :  { %5079 = vsyncpa [#allocation4], 1 }

</bundles_post_ra>
